<compile_context>
chip_gen: v5e
topology: v5e:2x2
jax: 0.10.0
libtpu: 0.0.40
codegen_flags: <defaults>
</compile_context>

<pallas_src>
import functools

import jax
import jax.numpy as jnp
from jax.experimental import pallas as pl
from jax.experimental.pallas import tpu as pltpu

PATCH = 14
VIT_EMBED = 32
VIT_DEPTH = 4
FEAT_CHS = [8, 16, 32, 64]
NDEPTHS = [8, 4, 4, 4]
DEPTH_RATIOS = [4.0, 2.0, 1.0, 0.5]

_VMEM_LIMIT = 48 * 1024 * 1024  # < 64 MiB physical on v7x, fine on v5e/v6e


def _pick_tile(n, candidates=(2048, 1024, 512, 256, 128)):
    """Largest candidate tile that divides n with >= 2 grid steps, else n."""
    for t in candidates:
        if n % t == 0 and n // t >= 2:
            return t
    return n


# ----------------------------------------------------------------------------
# Pallas kernels
# ----------------------------------------------------------------------------


def _gemm_kernel(x_ref, w_ref, b_ref, o_ref, *, activation):
    # bf16 MXU operands, f32 accumulation; bias + activation fused before store.
    acc = jnp.dot(w_ref[...], x_ref[0], preferred_element_type=jnp.float32)
    acc = acc + b_ref[...]
    if activation == "relu":
        acc = jnp.maximum(acc, 0.0)
    elif activation == "gelu":
        acc = jax.nn.gelu(acc)
    o_ref[0] = acc.astype(o_ref.dtype)


def gemm_nkm(x, w, b, activation=None, out_dtype=jnp.bfloat16):
    """Per-image GEMM: y[n] = act(w @ x[n] + b).

    x: (N, K, M) with lane axis = pixels/tokens (lane-dense stores);
    w: (Out, K); b: (Out,). bf16 operands, f32 accumulation, bf16 output.
    """
    N, K, M = x.shape
    Out = w.shape[0]
    tm = _pick_tile(M)
    kernel = functools.partial(_gemm_kernel, activation=activation)
    return pl.pallas_call(
        kernel,
        out_shape=jax.ShapeDtypeStruct((N, Out, M), out_dtype),
        grid=(N, M // tm),
        in_specs=[pl.BlockSpec((1, K, tm), lambda n, i: (n, 0, i)),
                  pl.BlockSpec((Out, K), lambda n, i: (0, 0)),
                  pl.BlockSpec((Out, 1), lambda n, i: (0, 0))],
        out_specs=pl.BlockSpec((1, Out, tm), lambda n, i: (n, 0, i)),
        compiler_params=pltpu.CompilerParams(
            dimension_semantics=("parallel", "parallel")),
    )(x.astype(jnp.bfloat16), w.astype(jnp.bfloat16),
      jnp.asarray(b, jnp.float32).reshape(Out, 1))


def _conv3x3_kernel(x_ref, w_ref, b_ref, o_ref, *, wp, m_out, activation):
    # x: (C, Mtot) = flattened padded image; the 9 conv taps are shifted lane
    # windows of the SAME VMEM-resident block -> no HBM im2col tensor.
    x = x_ref[0]
    acc = None
    for di in range(3):
        for dj in range(3):
            off = di * wp + dj
            win = x[:, off:off + m_out]                                # (C, Mout)
            part = jnp.dot(w_ref[3 * di + dj], win,
                           preferred_element_type=jnp.float32)         # (Cout, Mout)
            acc = part if acc is None else acc + part
    acc = acc + b_ref[...]
    if activation == "relu":
        acc = jnp.maximum(acc, 0.0)
    o_ref[0] = acc.astype(o_ref.dtype)


def conv3x3(x, w9, b, stride=1, activation=None):
    """3x3 conv, padding=1. x: (N, C, H, W) bf16, w9: (9, Cout, C)."""
    N, C, H, W = x.shape
    Cout = w9.shape[1]
    Hp, Wp = H + 2, W + 2
    Ho = (H - 1) // stride + 1
    Wo = (W - 1) // stride + 1
    m_out = H * Wp
    m_tot = max(Hp * Wp, m_out + 2 * Wp + 2)
    xp = jnp.pad(x, ((0, 0), (0, 0), (1, 1), (1, 1))).reshape(N, C, Hp * Wp)
    if m_tot > Hp * Wp:
        xp = jnp.pad(xp, ((0, 0), (0, 0), (0, m_tot - Hp * Wp)))
    kernel = functools.partial(_conv3x3_kernel, wp=Wp, m_out=m_out,
                               activation=activation)
    y = pl.pallas_call(
        kernel,
        out_shape=jax.ShapeDtypeStruct((N, Cout, m_out), jnp.bfloat16),
        grid=(N,),
        in_specs=[pl.BlockSpec((1, C, m_tot), lambda n: (n, 0, 0)),
                  pl.BlockSpec((9, Cout, C), lambda n: (0, 0, 0)),
                  pl.BlockSpec((Cout, 1), lambda n: (0, 0))],
        out_specs=pl.BlockSpec((1, Cout, m_out), lambda n: (n, 0, 0)),
        compiler_params=pltpu.CompilerParams(
            dimension_semantics=("parallel",),
            vmem_limit_bytes=_VMEM_LIMIT),
    )(xp.astype(jnp.bfloat16), w9.astype(jnp.bfloat16),
      jnp.asarray(b, jnp.float32).reshape(Cout, 1))
    y = y.reshape(N, Cout, H, Wp)
    if stride == 1:
        return y[:, :, :, :W]
    # TODO(synk): stride-2 computes the full stride-1 map and subsamples; a
    # phase-decomposed input would avoid the redundant output rows/cols.
    return y[:, :, 0:2 * Ho:2, 0:2 * Wo:2]


def _ln_kernel(x_ref, g_ref, b_ref, o_ref):
    x = x_ref[0].astype(jnp.float32)                 # (C, T), f32 statistics
    mu = jnp.mean(x, axis=0, keepdims=True)
    xc = x - mu
    var = jnp.mean(xc * xc, axis=0, keepdims=True)
    y = xc * jax.lax.rsqrt(var + 1e-5) * g_ref[...] + b_ref[...]
    o_ref[0] = y.astype(o_ref.dtype)


def layernorm_ct(x, g, b):
    """LayerNorm over the channel axis of (N, C, T) tokens (bf16 in/out)."""
    N, C, T = x.shape
    tt = _pick_tile(T, (512, 256, 128))
    return pl.pallas_call(
        _ln_kernel,
        out_shape=jax.ShapeDtypeStruct((N, C, T), jnp.bfloat16),
        grid=(N, T // tt),
        in_specs=[pl.BlockSpec((1, C, tt), lambda n, i: (n, 0, i)),
                  pl.BlockSpec((C, 1), lambda n, i: (0, 0)),
                  pl.BlockSpec((C, 1), lambda n, i: (0, 0))],
        out_specs=pl.BlockSpec((1, C, tt), lambda n, i: (n, 0, i)),
        compiler_params=pltpu.CompilerParams(
            dimension_semantics=("parallel", "parallel")),
    )(x.astype(jnp.bfloat16),
      jnp.asarray(g, jnp.float32).reshape(C, 1),
      jnp.asarray(b, jnp.float32).reshape(C, 1))


def _mha_kernel(q_ref, k_ref, v_ref, o_ref, *, heads, scale):
    # TODO(synk): K/V are consumed as a single block (no online-softmax KV
    # streaming); fine for the token counts used here.
    q = q_ref[0]
    k = k_ref[0]
    v = v_ref[0]
    hd = q.shape[0] // heads
    outs = []
    for h in range(heads):
        qh = q[h * hd:(h + 1) * hd]
        kh = k[h * hd:(h + 1) * hd]
        vh = v[h * hd:(h + 1) * hd]
        s = jax.lax.dot_general(qh, kh, (((0,), (0,)), ((), ())),
                                preferred_element_type=jnp.float32) * scale
        m = jnp.max(s, axis=-1, keepdims=True)
        e = jnp.exp(s - m)
        p = e * pl.reciprocal(jnp.sum(e, axis=-1, keepdims=True), approx=True)
        outs.append(jax.lax.dot_general(
            vh, p.astype(vh.dtype), (((1,), (1,)), ((), ())),
            preferred_element_type=jnp.float32))                 # (hd, Tq)
    # single full-width lane-dense store instead of per-head masked stores
    o_ref[0] = jnp.concatenate(outs, axis=0).astype(o_ref.dtype)


def fused_mha(q, k, v, heads):
    """q: (N, E, Tq), k/v: (N, E, Tk) bf16 -> (N, E, Tq) bf16."""
    N, E, Tq = q.shape
    Tk = k.shape[2]
    scale = 1.0 / float((E // heads) ** 0.5)
    tq = _pick_tile(Tq, (512, 256, 128))
    kernel = functools.partial(_mha_kernel, heads=heads, scale=scale)
    return pl.pallas_call(
        kernel,
        out_shape=jax.ShapeDtypeStruct((N, E, Tq), jnp.bfloat16),
        grid=(N, Tq // tq),
        in_specs=[pl.BlockSpec((1, E, tq), lambda n, i: (n, 0, i)),
                  pl.BlockSpec((1, E, Tk), lambda n, i: (n, 0, 0)),
                  pl.BlockSpec((1, E, Tk), lambda n, i: (n, 0, 0))],
        out_specs=pl.BlockSpec((1, E, tq), lambda n, i: (n, 0, i)),
        compiler_params=pltpu.CompilerParams(
            dimension_semantics=("parallel", "parallel"),
            vmem_limit_bytes=_VMEM_LIMIT),
    )(q.astype(jnp.bfloat16), k.astype(jnp.bfloat16), v.astype(jnp.bfloat16))


def _stage_fusion_kernel(ref_ref, warped_ref, depth_ref, depth_out, conf_out,
                         *, n_src, c, tmp):
    ref = ref_ref[0].astype(jnp.float32)                          # (C, tp)
    dep = depth_ref[0]                                            # (D, tp) f32
    corr = jnp.zeros(dep.shape, jnp.float32)
    for s in range(n_src):
        w_s = warped_ref[0, s * c:(s + 1) * c].astype(jnp.float32)  # (C, D, tp)
        corr = corr + jnp.sum(ref[:, None, :] * w_s, axis=0)
    logits = corr * (tmp / float(n_src * c))
    m = jnp.max(logits, axis=0, keepdims=True)
    e = jnp.exp(logits - m)
    # exact reciprocal: these probabilities directly regress depth/confidence.
    p = e / jnp.sum(e, axis=0, keepdims=True)
    depth_out[0] = jnp.sum(p * dep, axis=0, keepdims=True)
    conf_out[0] = jnp.max(p, axis=0, keepdims=True)


def stage_fusion(ref_feat, warped_sc, depth_samples, n_src, tmp):
    """Cost-volume correlation + temperature softmax depth regression.

    ref_feat: (B, C, P) bf16; warped_sc: (B, n_src*C, D, P) bf16 (natural
    layout, no transpose); depth_samples: (B, D, P) f32.
    """
    B, C, P = ref_feat.shape
    D = depth_samples.shape[1]
    tp = _pick_tile(P, (512, 256, 128))
    kernel = functools.partial(_stage_fusion_kernel, n_src=n_src, c=C,
                               tmp=float(tmp))
    depth, conf = pl.pallas_call(
        kernel,
        out_shape=(jax.ShapeDtypeStruct((B, 1, P), jnp.float32),
                   jax.ShapeDtypeStruct((B, 1, P), jnp.float32)),
        grid=(B, P // tp),
        in_specs=[pl.BlockSpec((1, C, tp), lambda b, i: (b, 0, i)),
                  pl.BlockSpec((1, n_src * C, D, tp), lambda b, i: (b, 0, 0, i)),
                  pl.BlockSpec((1, D, tp), lambda b, i: (b, 0, i))],
        out_specs=(pl.BlockSpec((1, 1, tp), lambda b, i: (b, 0, i)),
                   pl.BlockSpec((1, 1, tp), lambda b, i: (b, 0, i))),
        compiler_params=pltpu.CompilerParams(
            dimension_semantics=("parallel", "parallel"),
            vmem_limit_bytes=_VMEM_LIMIT),
    )(ref_feat.astype(jnp.bfloat16), warped_sc.astype(jnp.bfloat16),
      depth_samples.astype(jnp.float32))
    return depth[:, 0], conf[:, 0]


# ----------------------------------------------------------------------------
# Conv / attention building blocks
# ----------------------------------------------------------------------------


def conv1x1(x, w, b, activation=None):
    N, C, H, W = x.shape
    y = gemm_nkm(x.reshape(N, C, H * W), w, b, activation)
    return y.reshape(N, -1, H, W)


def upsample2(x):
    N, C, H, W = x.shape
    return jax.image.resize(x, (N, C, 2 * H, 2 * W), method="nearest")


def self_attention(x, p, heads):
    """x: (N, E, T) bf16. Fused QKV projection + fused MHA + output proj."""
    E = x.shape[1]
    qkv = gemm_nkm(x, p["wqkv"], p["bqkv"])               # (N, 3E, T)
    q, k, v = qkv[:, :E], qkv[:, E:2 * E], qkv[:, 2 * E:]
    o = fused_mha(q, k, v, heads)
    return gemm_nkm(o, p["wo"], p["bo"])


def cross_attention(xq, xkv, p, heads):
    E = xq.shape[1]
    q = gemm_nkm(xq, p["wq"], p["bq"])
    kv = gemm_nkm(xkv, p["wkv"], p["bkv"])                # (N, 2E, T)
    o = fused_mha(q, kv[:, :E], kv[:, E:], heads)
    return gemm_nkm(o, p["wo"], p["bo"])


def vit_block(x, p, heads=2):
    h = layernorm_ct(x, p["ln1_g"], p["ln1_b"])
    x = x + self_attention(h, p["attn"], heads)           # LayerScale folded into Wo
    h = layernorm_ct(x, p["ln2_g"], p["ln2_b"])
    m = gemm_nkm(h, p["w1"], p["b1"], activation="gelu")
    m = gemm_nkm(m, p["w2"], p["b2"])                     # LayerScale folded into W2
    return x + m


# ----------------------------------------------------------------------------
# Sub-modules (FPN encoder/decoder, tiny DINOv2 ViT, CrossVITDecoder, FMT)
# ----------------------------------------------------------------------------


def fpn_encoder(x, p):
    c0 = conv3x3(x, p["e0_w"], p["e0_b"], 1, "relu")
    c1 = conv3x3(c0, p["e1_w"], p["e1_b"], 2, "relu")
    c2 = conv3x3(c1, p["e2_w"], p["e2_b"], 2, "relu")
    c3 = conv3x3(c2, p["e3_w"], p["e3_b"], 2, "relu")
    return c0, c1, c2, c3


def fpn_decoder(c0, c1, c2, c3, p):
    i3 = conv1x1(c3, p["l3_w"], p["l3_b"])
    feat1 = i3
    i2 = conv1x1(c2, p["l2_w"], p["l2_b"]) + conv1x1(upsample2(i3), p["u3_w"], p["u3_b"])
    feat2 = conv3x3(i2, p["o2_w"], p["o2_b"])
    i1 = conv1x1(c1, p["l1_w"], p["l1_b"]) + conv1x1(upsample2(feat2), p["u2_w"], p["u2_b"])
    feat3 = conv3x3(i1, p["o3_w"], p["o3_b"])
    i0 = conv1x1(c0, p["l0_w"], p["l0_b"]) + conv1x1(upsample2(feat3), p["u1_w"], p["u1_b"])
    feat4 = conv3x3(i0, p["o4_w"], p["o4_b"])
    return feat1, feat2, feat3, feat4


def patch_embed(x, p):
    # TODO(synk): pos-embed bicubic interpolation for arbitrary ViT sizes is
    # omitted; pos-embed is sized for the fixed 2x2(+cls) token grid.
    N, C, vh, vw = x.shape
    ph, pw = vh // PATCH, vw // PATCH
    patches = (x.reshape(N, C, ph, PATCH, pw, PATCH)
                .transpose(0, 1, 3, 5, 2, 4)
                .reshape(N, C * PATCH * PATCH, ph * pw))
    tok = gemm_nkm(patches, p["patch_w"], p["patch_b"])           # (N, E, T')
    cls = jnp.broadcast_to(p["cls"].astype(jnp.bfloat16)[None],
                           (N, tok.shape[1], 1))
    tok = jnp.concatenate([cls, tok], axis=2) + p["pos"].astype(jnp.bfloat16)[None]
    return tok                                                    # (N, E, 1+T')


def cross_vit_decoder(vit_outs, p):
    # TODO(synk): CrossVITDecoder's epipolar cross-view attention is simplified
    # to per-view self-attention over the concatenated interval features.
    x = jnp.concatenate(vit_outs, axis=1)[:, :, 1:]               # drop cls token
    h = gemm_nkm(x, p["in_w"], p["in_b"])                         # (N, 64, T-1)
    hn = layernorm_ct(h, p["ln_g"], p["ln_b"])
    return h + self_attention(hn, p["attn"], heads=2)


def vit_forward(vit_imgs, params):
    tok = patch_embed(vit_imgs, params["vit"])
    x = tok
    feats = []
    for blk in params["vit"]["blocks"]:
        x = vit_block(x, blk, heads=2)
        feats.append(x)
    return cross_vit_decoder(feats, params["dvit"])               # (N, 64, T-1)


def fmt_module(features, p):
    """Simplified FMT_with_pathway: self/cross attention at stage1 + pathway."""
    f1 = features["stage1"]
    B, V, C, h1, w1 = f1.shape
    T = h1 * w1
    tok = f1.reshape(B * V, C, T)                                 # (N, C, T), no transpose
    tn = layernorm_ct(tok, p["ln_g"], p["ln_b"])
    tok = tok + self_attention(tn, p["self_attn"], heads=2)
    tok = tok.reshape(B, V, C, T)
    ref_t = tok[:, 0]
    if V > 1:
        src_t = tok[:, 1:].reshape(B * (V - 1), C, T)
        src_n = layernorm_ct(src_t, p["ln_g"], p["ln_b"])
        ref_n = layernorm_ct(ref_t, p["ln_g"], p["ln_b"])
        ref_rep = jnp.repeat(ref_n, V - 1, axis=0)
        src_out = src_t + cross_attention(src_n, ref_rep, p["cross_attn"], heads=2)
        new_tok = jnp.concatenate(
            [ref_t[:, None], src_out.reshape(B, V - 1, C, T)], axis=1)
    else:
        new_tok = ref_t[:, None]
    out = {"stage1": new_tok.reshape(B, V, C, h1, w1)}
    prev = out["stage1"]
    for s in range(2, 5):
        f = features[f"stage{s}"]
        Bp, Vp, Cp, Hs, Ws = prev.shape
        up = jax.image.resize(prev, (Bp, Vp, Cp, 2 * Hs, 2 * Ws), method="nearest")
        path = gemm_nkm(up.reshape(Bp * Vp, Cp, 4 * Hs * Ws),
                        p[f"path{s}_w"], p[f"path{s}_b"])
        Cout = path.shape[1]
        out[f"stage{s}"] = f + path.reshape(Bp, Vp, Cout, 2 * Hs, 2 * Ws)
        prev = out[f"stage{s}"]
    return out


# ----------------------------------------------------------------------------
# Depth sampling, homography warping, StageNet
# ----------------------------------------------------------------------------


def init_inverse_range(depth_values, ndepth, H, W):
    inv_min = 1.0 / depth_values[:, 0]
    inv_max = 1.0 / depth_values[:, -1]
    t = jnp.arange(ndepth, dtype=jnp.float32) / (ndepth - 1)
    inv = inv_max[:, None] + (inv_min - inv_max)[:, None] * t[None]
    depth = 1.0 / inv
    return jnp.broadcast_to(depth[:, :, None, None],
                            (depth.shape[0], ndepth, H, W)).astype(jnp.float32)


def schedule_range(cur_depth, ndepth, depth_interval, H, W):
    B = cur_depth.shape[0]
    d_min = cur_depth - (ndepth / 2.0) * depth_interval[:, None, None]
    d_max = cur_depth + (ndepth / 2.0) * depth_interval[:, None, None]
    itv = (d_max - d_min) / (ndepth - 1)
    samples = d_min[:, None] + (jnp.arange(ndepth, dtype=jnp.float32)[None, :, None, None]
                                * itv[:, None])
    samples = jnp.clip(samples, 1e-3, None)
    return jax.image.resize(samples, (B, ndepth, H, W), method="bilinear")


def homo_warping(src_fea, src_proj, ref_proj, depth_values):
    # TODO(synk): gather-based bilinear grid_sample stays in plain JAX
    # (data-dependent gather is not expressible with a BlockSpec index_map).
    src_fea = src_fea.astype(jnp.float32)
    B, C, H, W = src_fea.shape
    D = depth_values.shape[1]
    proj = jnp.einsum("bij,bjk->bik", src_proj, jnp.linalg.inv(ref_proj))
    rot, trans = proj[:, :3, :3], proj[:, :3, 3]
    yy, xx = jnp.meshgrid(jnp.arange(H, dtype=jnp.float32),
                          jnp.arange(W, dtype=jnp.float32), indexing="ij")
    xyz = jnp.stack([xx.reshape(-1), yy.reshape(-1),
                     jnp.ones(H * W, jnp.float32)], axis=0)
    rot_xyz = jnp.einsum("bij,jp->bip", rot, xyz)
    dep = depth_values.reshape(B, 1, D, H * W)
    proj_xyz = rot_xyz[:, :, None, :] * dep + trans[:, :, None, None]
    z = proj_xyz[:, 2]
    z = jnp.where(jnp.abs(z) < 1e-6, 1e-6, z)
    px, py = proj_xyz[:, 0] / z, proj_xyz[:, 1] / z

    def sample_one(fea, pxb, pyb):
        x0, y0 = jnp.floor(pxb), jnp.floor(pyb)
        wx, wy = pxb - x0, pyb - y0
        flat = fea.reshape(C, H * W)

        def gath(xi, yi):
            valid = (xi >= 0) & (xi <= W - 1) & (yi >= 0) & (yi <= H - 1)
            xc = jnp.clip(xi, 0, W - 1).astype(jnp.int32)
            yc = jnp.clip(yi, 0, H - 1).astype(jnp.int32)
            g = flat[:, yc * W + xc]
            return g * valid[None].astype(jnp.float32)

        out = (gath(x0, y0) * ((1 - wx) * (1 - wy))[None]
               + gath(x0 + 1, y0) * (wx * (1 - wy))[None]
               + gath(x0, y0 + 1) * ((1 - wx) * wy)[None]
               + gath(x0 + 1, y0 + 1) * (wx * wy)[None])
        return out.reshape(C, D, H, W)

    return jax.vmap(sample_one)(src_fea, px, py)


def stage_net(features_stage, proj_stage, depth_samples, tmp):
    # TODO(synk): 3D cost-regularization UNet (CostRegNet) omitted; the
    # view-averaged correlation goes straight to the in-kernel softmax.
    B, V, C, H, W = features_stage.shape
    D = depth_samples.shape[1]
    ref_feat = features_stage[:, 0]
    extr, intr = proj_stage[:, :, 0], proj_stage[:, :, 1]
    proj_new = extr.at[:, :, :3, :4].set(
        jnp.einsum("bvij,bvjk->bvik", intr[:, :, :3, :3], extr[:, :, :3, :4]))
    ref_proj = proj_new[:, 0]
    if V > 1:
        warped = jnp.stack(
            [homo_warping(features_stage[:, vi], proj_new[:, vi], ref_proj,
                          depth_samples)
             for vi in range(1, V)], axis=1)                      # (B, S, C, D, H, W)
        n_src = V - 1
    else:
        # TODO(synk): single-view fallback correlates the reference with itself.
        warped = jnp.broadcast_to(
            ref_feat[:, None, :, None].astype(jnp.float32), (B, 1, C, D, H, W))
        n_src = 1
    warped_sc = warped.reshape(B, n_src * C, D, H * W)            # natural layout
    ref2 = ref_feat.reshape(B, C, H * W)
    d2 = depth_samples.reshape(B, D, H * W)
    depth, conf = stage_fusion(ref2, warped_sc, d2, n_src, tmp)
    return {"depth": depth.reshape(B, H, W),
            "photometric_confidence": conf.reshape(B, H, W),
            "depth_values": depth_samples}


# ----------------------------------------------------------------------------
# Full forward
# ----------------------------------------------------------------------------


def dinov2_mvsnet_forward(imgs, proj_matrices, depth_values, params,
                          tmp=(5.0, 5.0, 5.0, 1.0)):
    B, V, _, H, W = imgs.shape
    depth_interval = depth_values[:, 1] - depth_values[:, 0]
    rescale = 1.0
    vit_h = int(H * rescale) // PATCH * PATCH
    vit_w = int(W * rescale) // PATCH * PATCH

    x = imgs.reshape(B * V, 3, H, W)
    c0, c1, c2, c3 = fpn_encoder(x.astype(jnp.bfloat16), params["enc"])

    vit_imgs = jax.image.resize(x, (B * V, 3, vit_h, vit_w), method="bicubic")
    vit_tokens = vit_forward(vit_imgs, params)                     # (N, 64, ph*pw)
    ph, pw = vit_h // PATCH, vit_w // PATCH
    vit_feat = vit_tokens.reshape(B * V, FEAT_CHS[3], ph, pw)
    if vit_feat.shape[2] != c3.shape[2] or vit_feat.shape[3] != c3.shape[3]:
        vit_feat = jax.image.resize(
            vit_feat.astype(jnp.float32),
            (vit_feat.shape[0], vit_feat.shape[1], c3.shape[2], c3.shape[3]),
            method="bilinear").astype(jnp.bfloat16)
    c3 = c3 + vit_feat

    f1, f2, f3, f4 = fpn_decoder(c0, c1, c2, c3, params["dec"])
    features = {}
    for i, f in enumerate([f1, f2, f3, f4]):
        Ns, Cs, Hs, Ws = f.shape
        features[f"stage{i + 1}"] = f.reshape(B, V, Cs, Hs, Ws)
    features = fmt_module(features, params["fmt"])

    outputs = {}
    outputs_stage = {}
    prob_maps = jnp.zeros((B, H, W), jnp.float32)
    valid_count = 0
    for s in range(len(NDEPTHS)):
        proj_s = proj_matrices[f"stage{s + 1}"]
        feat_s = features[f"stage{s + 1}"]
        _, _, C, Hs, Ws = feat_s.shape
        if s == 0:
            depth_samples = init_inverse_range(depth_values, NDEPTHS[0], Hs, Ws)
        else:
            depth_samples = schedule_range(outputs_stage["depth"], NDEPTHS[s],
                                           DEPTH_RATIOS[s] * depth_interval, Hs, Ws)
        outputs_stage = stage_net(feat_s, proj_s, depth_samples, tmp[s])
        outputs[f"stage{s + 1}"] = outputs_stage
        conf = outputs_stage["photometric_confidence"]
        if conf.shape[1] != H or conf.shape[2] != W:
            conf = jax.image.resize(conf, (B, H, W), method="nearest")
        prob_maps = prob_maps + conf
        valid_count += 1
        outputs.update(outputs_stage)
    outputs["refined_depth"] = outputs_stage["depth"]
    outputs["photometric_confidence"] = prob_maps / float(valid_count)
    return outputs


# ----------------------------------------------------------------------------
# Deterministic parameter init & synthetic inputs
# ----------------------------------------------------------------------------


class KeyGen:
    def __init__(self, seed):
        self.key = jax.random.PRNGKey(seed)
        self.c = 0

    def __call__(self, shape, scale=0.05):
        self.c += 1
        return scale * jax.random.normal(jax.random.fold_in(self.key, self.c),
                                         shape, jnp.float32)


def init_params(seed=0):
    kg = KeyGen(seed)
    E, HID, FC = VIT_EMBED, 4 * VIT_EMBED, FEAT_CHS

    def attn_self(dim):
        return {"wqkv": jnp.concatenate([kg((dim, dim)), kg((dim, dim)),
                                         kg((dim, dim))], axis=0),
                "bqkv": jnp.zeros((3 * dim,)),
                "wo": kg((dim, dim)), "bo": jnp.zeros((dim,))}

    def attn_cross(dim):
        return {"wq": kg((dim, dim)), "bq": jnp.zeros((dim,)),
                "wkv": jnp.concatenate([kg((dim, dim)), kg((dim, dim))], axis=0),
                "bkv": jnp.zeros((2 * dim,)),
                "wo": kg((dim, dim)), "bo": jnp.zeros((dim,))}

    def block_p(dim, hid):
        ls1 = jnp.ones((dim, 1))
        ls2 = jnp.ones((dim, 1))
        attn = attn_self(dim)
        attn["wo"] = ls1 * attn["wo"]        # fold DINOv2 LayerScale into Wo / W2
        return {"ln1_g": jnp.ones((dim,)), "ln1_b": jnp.zeros((dim,)),
                "attn": attn,
                "ln2_g": jnp.ones((dim,)), "ln2_b": jnp.zeros((dim,)),
                "w1": kg((hid, dim)), "b1": jnp.zeros((hid,)),
                "w2": ls2 * kg((dim, hid)), "b2": jnp.zeros((dim,))}

    p = {}
    # conv weights in (9 taps, Cout, Cin) layout for the tap-accumulated kernel
    p["enc"] = {"e0_w": kg((9, FC[0], 3)), "e0_b": jnp.zeros((FC[0],)),
                "e1_w": kg((9, FC[1], FC[0])), "e1_b": jnp.zeros((FC[1],)),
                "e2_w": kg((9, FC[2], FC[1])), "e2_b": jnp.zeros((FC[2],)),
                "e3_w": kg((9, FC[3], FC[2])), "e3_b": jnp.zeros((FC[3],))}
    p["dec"] = {"l3_w": kg((FC[3], FC[3])), "l3_b": jnp.zeros((FC[3],)),
                "l2_w": kg((FC[2], FC[2])), "l2_b": jnp.zeros((FC[2],)),
                "l1_w": kg((FC[1], FC[1])), "l1_b": jnp.zeros((FC[1],)),
                "l0_w": kg((FC[0], FC[0])), "l0_b": jnp.zeros((FC[0],)),
                "u3_w": kg((FC[2], FC[3])), "u3_b": jnp.zeros((FC[2],)),
                "u2_w": kg((FC[1], FC[2])), "u2_b": jnp.zeros((FC[1],)),
                "u1_w": kg((FC[0], FC[1])), "u1_b": jnp.zeros((FC[0],)),
                "o2_w": kg((9, FC[2], FC[2])), "o2_b": jnp.zeros((FC[2],)),
                "o3_w": kg((9, FC[1], FC[1])), "o3_b": jnp.zeros((FC[1],)),
                "o4_w": kg((9, FC[0], FC[0])), "o4_b": jnp.zeros((FC[0],))}
    p["vit"] = {"patch_w": kg((E, 3 * PATCH * PATCH)), "patch_b": jnp.zeros((E,)),
                "cls": kg((E, 1)), "pos": kg((E, 5)),
                "blocks": [block_p(E, HID) for _ in range(VIT_DEPTH)]}
    p["dvit"] = {"in_w": kg((FC[3], VIT_DEPTH * E)), "in_b": jnp.zeros((FC[3],)),
                 "ln_g": jnp.ones((FC[3],)), "ln_b": jnp.zeros((FC[3],)),
                 "attn": attn_self(FC[3])}
    p["fmt"] = {"ln_g": jnp.ones((FC[3],)), "ln_b": jnp.zeros((FC[3],)),
                "self_attn": attn_self(FC[3]), "cross_attn": attn_cross(FC[3]),
                "path2_w": kg((FC[2], FC[3])), "path2_b": jnp.zeros((FC[2],)),
                "path3_w": kg((FC[1], FC[2])), "path3_b": jnp.zeros((FC[1],)),
                "path4_w": kg((FC[0], FC[1])), "path4_b": jnp.zeros((FC[0],))}
    return p


def make_proj_matrices(B, V, H, W):
    proj = {}
    for s in range(4):
        scale = 2 ** (3 - s)
        Hs, Ws = H // scale, W // scale
        intr = jnp.array([[float(Ws), 0.0, Ws / 2.0, 0.0],
                          [0.0, float(Hs), Hs / 2.0, 0.0],
                          [0.0, 0.0, 1.0, 0.0],
                          [0.0, 0.0, 0.0, 1.0]], jnp.float32)
        mats = []
        for v in range(V):
            extr = jnp.eye(4, dtype=jnp.float32).at[0, 3].set(0.1 * v)
            mats.append(jnp.stack([extr, intr], axis=0))
        stage_m = jnp.broadcast_to(jnp.stack(mats, 0)[None], (B, V, 2, 4, 4))
        proj[f"stage{s + 1}"] = stage_m
    return proj


if __name__ == "__main__":
    B, V, H, W = 1, 2, 32, 32
    key = jax.random.PRNGKey(0)
    imgs = jax.random.uniform(key, (B, V, 3, H, W), jnp.float32)
    depth_values = jnp.broadcast_to(
        jnp.linspace(2.0, 8.0, 8, dtype=jnp.float32)[None], (B, 8))
    proj_matrices = make_proj_matrices(B, V, H, W)
    params = init_params(0)

    outputs = dinov2_mvsnet_forward(imgs, proj_matrices, depth_values, params)
    jax.block_until_ready(outputs["refined_depth"])
    jax.block_until_ready(outputs["photometric_confidence"])

    assert outputs["refined_depth"].shape == (B, H, W)
    assert outputs["photometric_confidence"].shape == (B, H, W)
    assert bool(jnp.all(jnp.isfinite(outputs["refined_depth"])))
    assert bool(jnp.all(jnp.isfinite(outputs["photometric_confidence"])))
    print("KERNEL_OK")
</pallas_src>

<mosaic_0001>
module attributes {stable_mosaic.version = 11 : i64} {
  func.func @_conv3x3_kernel(%arg0: i32, %arg1: memref<1x3x1158xbf16, #tpu.memory_space<vmem>>, %arg2: memref<9x8x3xbf16, #tpu.memory_space<vmem>>, %arg3: memref<8x1xf32, #tpu.memory_space<vmem>>, %arg4: memref<1x8x1088xbf16, #tpu.memory_space<vmem>>) attributes {dimension_semantics = [#tpu.dimension_semantics<parallel>], iteration_bounds = array<i64: 2>, scalar_prefetch = 0 : i64, scratch_operands = 0 : i64, tpu.core_type = #tpu.core_type<tc>, window_params = [{transform_indices = @transform_0, window_bounds = array<i64: 1, 3, 1158>}, {pipeline_mode = #tpu.pipeline_mode<synchronous>, transform_indices = @transform_1, window_bounds = array<i64: 9, 8, 3>}, {pipeline_mode = #tpu.pipeline_mode<synchronous>, transform_indices = @transform_2, window_bounds = array<i64: 8, 1>}, {transform_indices = @transform_3, window_bounds = array<i64: 1, 8, 1088>}]} {
    %c0 = arith.constant 0 : index
    %c0_0 = arith.constant 0 : index
    %c0_1 = arith.constant 0 : index
    %0 = vector.load %arg1[%c0, %c0_0, %c0_1] : memref<1x3x1158xbf16, #tpu.memory_space<vmem>>, vector<1x3x1158xbf16>
    %1 = vector.shape_cast %0 : vector<1x3x1158xbf16> to vector<3x1158xbf16>
    %2 = vector.extract_strided_slice %1 {offsets = [0, 0], sizes = [3, 1088], strides = [1, 1]} : vector<3x1158xbf16> to vector<3x1088xbf16>
    %c0_2 = arith.constant 0 : index
    %c0_3 = arith.constant 0 : index
    %c0_4 = arith.constant 0 : index
    %3 = vector.load %arg2[%c0_2, %c0_3, %c0_4] : memref<9x8x3xbf16, #tpu.memory_space<vmem>>, vector<1x8x3xbf16>
    %4 = vector.shape_cast %3 : vector<1x8x3xbf16> to vector<8x3xbf16>
    %cst = arith.constant dense<0.000000e+00> : vector<8x1088xf32>
    %5 = tpu.matmul %4, %2, %cst {dimension_numbers = #tpu.dot_dimension_numbers<[1], [0], [0], [1], [0, 0, 1, 1], [], []>} : vector<8x3xbf16>, vector<3x1088xbf16>, vector<8x1088xf32> -> vector<8x1088xf32>
    %6 = vector.extract_strided_slice %1 {offsets = [0, 1], sizes = [3, 1088], strides = [1, 1]} : vector<3x1158xbf16> to vector<3x1088xbf16>
    %c1 = arith.constant 1 : index
    %c0_5 = arith.constant 0 : index
    %c0_6 = arith.constant 0 : index
    %7 = vector.load %arg2[%c1, %c0_5, %c0_6] : memref<9x8x3xbf16, #tpu.memory_space<vmem>>, vector<1x8x3xbf16>
    %8 = vector.shape_cast %7 : vector<1x8x3xbf16> to vector<8x3xbf16>
    %cst_7 = arith.constant dense<0.000000e+00> : vector<8x1088xf32>
    %9 = tpu.matmul %8, %6, %cst_7 {dimension_numbers = #tpu.dot_dimension_numbers<[1], [0], [0], [1], [0, 0, 1, 1], [], []>} : vector<8x3xbf16>, vector<3x1088xbf16>, vector<8x1088xf32> -> vector<8x1088xf32>
    %10 = arith.addf %5, %9 : vector<8x1088xf32>
    %11 = vector.extract_strided_slice %1 {offsets = [0, 2], sizes = [3, 1088], strides = [1, 1]} : vector<3x1158xbf16> to vector<3x1088xbf16>
    %c2 = arith.constant 2 : index
    %c0_8 = arith.constant 0 : index
    %c0_9 = arith.constant 0 : index
    %12 = vector.load %arg2[%c2, %c0_8, %c0_9] : memref<9x8x3xbf16, #tpu.memory_space<vmem>>, vector<1x8x3xbf16>
    %13 = vector.shape_cast %12 : vector<1x8x3xbf16> to vector<8x3xbf16>
    %cst_10 = arith.constant dense<0.000000e+00> : vector<8x1088xf32>
    %14 = tpu.matmul %13, %11, %cst_10 {dimension_numbers = #tpu.dot_dimension_numbers<[1], [0], [0], [1], [0, 0, 1, 1], [], []>} : vector<8x3xbf16>, vector<3x1088xbf16>, vector<8x1088xf32> -> vector<8x1088xf32>
    %15 = arith.addf %10, %14 : vector<8x1088xf32>
    %16 = vector.extract_strided_slice %1 {offsets = [0, 34], sizes = [3, 1088], strides = [1, 1]} : vector<3x1158xbf16> to vector<3x1088xbf16>
    %c3 = arith.constant 3 : index
    %c0_11 = arith.constant 0 : index
    %c0_12 = arith.constant 0 : index
    %17 = vector.load %arg2[%c3, %c0_11, %c0_12] : memref<9x8x3xbf16, #tpu.memory_space<vmem>>, vector<1x8x3xbf16>
    %18 = vector.shape_cast %17 : vector<1x8x3xbf16> to vector<8x3xbf16>
    %cst_13 = arith.constant dense<0.000000e+00> : vector<8x1088xf32>
    %19 = tpu.matmul %18, %16, %cst_13 {dimension_numbers = #tpu.dot_dimension_numbers<[1], [0], [0], [1], [0, 0, 1, 1], [], []>} : vector<8x3xbf16>, vector<3x1088xbf16>, vector<8x1088xf32> -> vector<8x1088xf32>
    %20 = arith.addf %15, %19 : vector<8x1088xf32>
    %21 = vector.extract_strided_slice %1 {offsets = [0, 35], sizes = [3, 1088], strides = [1, 1]} : vector<3x1158xbf16> to vector<3x1088xbf16>
    %c4 = arith.constant 4 : index
    %c0_14 = arith.constant 0 : index
    %c0_15 = arith.constant 0 : index
    %22 = vector.load %arg2[%c4, %c0_14, %c0_15] : memref<9x8x3xbf16, #tpu.memory_space<vmem>>, vector<1x8x3xbf16>
    %23 = vector.shape_cast %22 : vector<1x8x3xbf16> to vector<8x3xbf16>
    %cst_16 = arith.constant dense<0.000000e+00> : vector<8x1088xf32>
    %24 = tpu.matmul %23, %21, %cst_16 {dimension_numbers = #tpu.dot_dimension_numbers<[1], [0], [0], [1], [0, 0, 1, 1], [], []>} : vector<8x3xbf16>, vector<3x1088xbf16>, vector<8x1088xf32> -> vector<8x1088xf32>
    %25 = arith.addf %20, %24 : vector<8x1088xf32>
    %26 = vector.extract_strided_slice %1 {offsets = [0, 36], sizes = [3, 1088], strides = [1, 1]} : vector<3x1158xbf16> to vector<3x1088xbf16>
    %c5 = arith.constant 5 : index
    %c0_17 = arith.constant 0 : index
    %c0_18 = arith.constant 0 : index
    %27 = vector.load %arg2[%c5, %c0_17, %c0_18] : memref<9x8x3xbf16, #tpu.memory_space<vmem>>, vector<1x8x3xbf16>
    %28 = vector.shape_cast %27 : vector<1x8x3xbf16> to vector<8x3xbf16>
    %cst_19 = arith.constant dense<0.000000e+00> : vector<8x1088xf32>
    %29 = tpu.matmul %28, %26, %cst_19 {dimension_numbers = #tpu.dot_dimension_numbers<[1], [0], [0], [1], [0, 0, 1, 1], [], []>} : vector<8x3xbf16>, vector<3x1088xbf16>, vector<8x1088xf32> -> vector<8x1088xf32>
    %30 = arith.addf %25, %29 : vector<8x1088xf32>
    %31 = vector.extract_strided_slice %1 {offsets = [0, 68], sizes = [3, 1088], strides = [1, 1]} : vector<3x1158xbf16> to vector<3x1088xbf16>
    %c6 = arith.constant 6 : index
    %c0_20 = arith.constant 0 : index
    %c0_21 = arith.constant 0 : index
    %32 = vector.load %arg2[%c6, %c0_20, %c0_21] : memref<9x8x3xbf16, #tpu.memory_space<vmem>>, vector<1x8x3xbf16>
    %33 = vector.shape_cast %32 : vector<1x8x3xbf16> to vector<8x3xbf16>
    %cst_22 = arith.constant dense<0.000000e+00> : vector<8x1088xf32>
    %34 = tpu.matmul %33, %31, %cst_22 {dimension_numbers = #tpu.dot_dimension_numbers<[1], [0], [0], [1], [0, 0, 1, 1], [], []>} : vector<8x3xbf16>, vector<3x1088xbf16>, vector<8x1088xf32> -> vector<8x1088xf32>
    %35 = arith.addf %30, %34 : vector<8x1088xf32>
    %36 = vector.extract_strided_slice %1 {offsets = [0, 69], sizes = [3, 1088], strides = [1, 1]} : vector<3x1158xbf16> to vector<3x1088xbf16>
    %c7 = arith.constant 7 : index
    %c0_23 = arith.constant 0 : index
    %c0_24 = arith.constant 0 : index
    %37 = vector.load %arg2[%c7, %c0_23, %c0_24] : memref<9x8x3xbf16, #tpu.memory_space<vmem>>, vector<1x8x3xbf16>
    %38 = vector.shape_cast %37 : vector<1x8x3xbf16> to vector<8x3xbf16>
    %cst_25 = arith.constant dense<0.000000e+00> : vector<8x1088xf32>
    %39 = tpu.matmul %38, %36, %cst_25 {dimension_numbers = #tpu.dot_dimension_numbers<[1], [0], [0], [1], [0, 0, 1, 1], [], []>} : vector<8x3xbf16>, vector<3x1088xbf16>, vector<8x1088xf32> -> vector<8x1088xf32>
    %40 = arith.addf %35, %39 : vector<8x1088xf32>
    %41 = vector.extract_strided_slice %1 {offsets = [0, 70], sizes = [3, 1088], strides = [1, 1]} : vector<3x1158xbf16> to vector<3x1088xbf16>
    %c8 = arith.constant 8 : index
    %c0_26 = arith.constant 0 : index
    %c0_27 = arith.constant 0 : index
    %42 = vector.load %arg2[%c8, %c0_26, %c0_27] : memref<9x8x3xbf16, #tpu.memory_space<vmem>>, vector<1x8x3xbf16>
    %43 = vector.shape_cast %42 : vector<1x8x3xbf16> to vector<8x3xbf16>
    %cst_28 = arith.constant dense<0.000000e+00> : vector<8x1088xf32>
    %44 = tpu.matmul %43, %41, %cst_28 {dimension_numbers = #tpu.dot_dimension_numbers<[1], [0], [0], [1], [0, 0, 1, 1], [], []>} : vector<8x3xbf16>, vector<3x1088xbf16>, vector<8x1088xf32> -> vector<8x1088xf32>
    %45 = arith.addf %40, %44 : vector<8x1088xf32>
    %c0_29 = arith.constant 0 : index
    %c0_30 = arith.constant 0 : index
    %46 = vector.load %arg3[%c0_29, %c0_30] : memref<8x1xf32, #tpu.memory_space<vmem>>, vector<8x1xf32>
    %47 = vector.broadcast %46 : vector<8x1xf32> to vector<8x1088xf32>
    %48 = arith.addf %45, %47 : vector<8x1088xf32>
    %cst_31 = arith.constant 0.000000e+00 : f32
    %49 = vector.broadcast %cst_31 : f32 to vector<8x1088xf32>
    %50 = arith.maximumf %48, %49 : vector<8x1088xf32>
    %51 = arith.truncf %50 : vector<8x1088xf32> to vector<8x1088xbf16>
    %c0_32 = arith.constant 0 : index
    %c0_33 = arith.constant 0 : index
    %c0_34 = arith.constant 0 : index
    %52 = vector.load %arg4[%c0_32, %c0_33, %c0_34] : memref<1x8x1088xbf16, #tpu.memory_space<vmem>>, vector<1x8x1088xbf16>
    %53 = vector.shape_cast %52 : vector<1x8x1088xbf16> to vector<8x1088xbf16>
    %54 = vector.shape_cast %51 : vector<8x1088xbf16> to vector<1x8x1088xbf16>
    tpu.vector_store %arg4[%c0_32, %c0_33, %c0_34], %54 {strides = array<i32>} : memref<1x8x1088xbf16, #tpu.memory_space<vmem>>, vector<1x8x1088xbf16>,
    return
  }
  func.func @transform_0(%arg0: i32) -> (i32, i32, i32) {
    %c0_i32 = arith.constant 0 : i32
    %c0_i32_0 = arith.constant 0 : i32
    %c0_i32_1 = arith.constant 0 : i32
    return %arg0, %c0_i32, %c0_i32_0 : i32, i32, i32
  }
  func.func @transform_1(%arg0: i32) -> (i32, i32, i32) {
    %c0_i32 = arith.constant 0 : i32
    %c0_i32_0 = arith.constant 0 : i32
    %c0_i32_1 = arith.constant 0 : i32
    %c0_i32_2 = arith.constant 0 : i32
    return %c0_i32, %c0_i32_0, %c0_i32_1 : i32, i32, i32
  }
  func.func @transform_2(%arg0: i32) -> (i32, i32) {
    %c0_i32 = arith.constant 0 : i32
    %c0_i32_0 = arith.constant 0 : i32
    %c0_i32_1 = arith.constant 0 : i32
    return %c0_i32, %c0_i32_0 : i32, i32
  }
  func.func @transform_3(%arg0: i32) -> (i32, i32, i32) {
    %c0_i32 = arith.constant 0 : i32
    %c0_i32_0 = arith.constant 0 : i32
    %c0_i32_1 = arith.constant 0 : i32
    return %arg0, %c0_i32, %c0_i32_0 : i32, i32, i32
  }
}

</mosaic_0001>

<bundles_post_ra>
// kernel: tpu_custom_call.1
= control target key start
LH: loop header
LB: loop body
LE: loop exit
PB: predicated region body
PF: predicated region fallthrough
CT: control target
= control target key end

     0   :  { %8 = vsyncpa [#allocation3], 0  ;;  %s3032_s0 = inlined_call_operand.vmem [shape: bf16[2,3,1158], index: 0, kind: input, shape index: {}]   ;;  %s3033_s1 = inlined_call_operand.vmem [shape: bf16[9,8,3], index: 1, kind: input, shape index: {}]   ;;  %s3034_s2 = inlined_call_operand.vmem [shape: f32[8,1], index: 2, kind: input, shape index: {}]   ;;  %s3035_s3 = inlined_call_operand.hbm [shape: bf16[2,8,1088], index: 3, kind: output, shape index: {}]  }
   0x1   :  { %10 = vsyncpa [#allocation3 + $0x1], 0  ;;  %s2350_s12 = smov 0   ;;  %s2352_s13 = smov 0  }
   0x2   :  { %s2354_s14 = smov 0   ;;  %s2356_s15 = smov 0  }
   0x3 LB: > { %s2371_s16 = sadd.s32 4294967295, %s2318_s15   ;;  %s2106_s17 = sadd.s32 4294967294, %s2318_s15   ;;  %s2318_s15 = sphi %s2356_s15, %s3041_s15   ;;  %s2314_s14 = sphi %s2354_s14, %s3040_s14   ;;  %s2310_s13 = sphi %s2352_s13, %s3039_s13   ;;  %s2306_s12 = sphi %s2350_s12, %s3038_s12  }
   0x4   : > { %s2375_s18 = sadd.s32 1, %s2318_s15   ;;  %s91_s19 = sadd.s32 1, %s2314_s14 }
   0x5   : > { %s88_s20 = ssub.s32 %s2318_s15, %s2375_s18  ;;  %p101_p0 = scmp.ne.s32.totalorder %s2314_s14, %s2310_s13 }
   0x6   : > { %p89_p1 = scmp.eq.s32.totalorder %s88_s20, 0  ;;  %p102_p2 = scmp.eq.s32.totalorder %s2371_s16, 1 }
   0x7   : > { %p107_p3 = scmp.ne.s32.totalorder %s2310_s13, %s2306_s12  ;;  %p108_p4 = scmp.eq.s32.totalorder %s2106_s17, 1 }
   0x8   : > { %s2386_s21 = scalar_select %p89_p1, %s2314_s14, %s91_s19  }
   0x9   : > { %p2388_p5 = por %p102_p2, %p101_p0  ;;  %p2392_p6 = por %p108_p4, %p107_p3 }
   0xa   : > { %p2109_p7 = scmp.ge.s32.totalorder %s2318_s15, 1  ;;  %p140_p8 = scmp.lt.s32.totalorder %s2318_s15, 3 }
   0xc   : > { %p141_p9 = pnand %p2109_p7, %p140_p8 }
   0xd   : > { %p164_p10 = scmp.lt.s32.totalorder (!%p141_p9), %s2371_s16, 1  ;;  %s2320_s29 = smov (!%p141_p9), 127  }
   0xe   : > { %144 = sbr.rel (%p141_p9) target bundleno = 619 (0x26b), region = 32  ;;  %s2321_s30 = smov (!%p141_p9), 126  }
   0xf   : > { %s2322_s4 = smov (!%p141_p9), 94   ;;  %s2323_s5 = smov (!%p141_p9), 93  }
  0x10   : > { %s2325_s8 = smov (!%p141_p9), 92   ;;  %s2326_s11 = smov (!%p141_p9), 60  }
  0x11   : > { %s2327_s20 = smov (!%p141_p9), 59   ;;  %s2328_s26 = smov (!%p141_p9), 58  }
  0x12   : > { %s161_s17 = sand.u32 (!%p141_p9), 1, %s2310_s13   ;;  %s2276_s7 = scalar_lea.hbm (!%p141_p9), %s3035_s3, 72 }
  0x13   : > { %s165_s24 = scalar_select %p164_p10, %s2371_s16, 1  ;;  %vm232_vm0 = vcmask 1040384   ;;  %vm219_vm1 = vcmask 1039360   ;;  %vm233_vm2 = vcmask 1041408   ;;  %v2324_v47 = vmov 65535  }
  0x14   : > { %v234_v48 = vsel %vm232_vm0, 4294967295, %v2324_v47  ;;  %v2460_v63 = vld [vmem:[%s3033_s1 + $0x4] sm:$0xf]  ;;  %vm228_vm3 = vcmask 23552   ;;  %vm573_vm4 = vcmask 1031168   ;;  %vm780_vm5 = vcmask 769024  }
  0x15   : > { %s2204_s25 = smul.u32 20, %s165_s24  ;;  %v2446_v50 = vsel %vm233_vm2, %v234_v48, 0  ;;  %vm987_vm6 = vcmask 760832   ;;  %vm1194_vm7 = vcmask 752640   ;;  %vm1405_vm8 = vcmask 490496  }
  0x16   : > { %vm1617_vm9 = vcmask 482304   ;;  %vm1829_vm10 = vcmask 474112   ;;  %s2203_s19 = smul.u32 36, %s161_s17  ;;  %vm2028_vm11 = vcmask 519168  }
  0x17   : > { %s168_s28 = scalar_lea.vmem %s3032_s0, %s2204_s25  ;;  %s2205_s24 = smul.u32 36, %s2371_s16 }
  0x18   : > { %v2403_v0 = vld [vmem:[%s168_s28] sm:$0xff]  ;;  %v2405_v1 = vld [vmem:[%s168_s28 + $0x8] sm:$0xff]  ;;  %v2409_v4 = vld [vmem:[%s168_s28 + $0x10] sm:$0xf] }
  0x19   : > { %177 = vst [vmem:[#allocation1] ss:$4 sm:$0xff] %v2403_v0  ;;  %s2042_s27 = scalar_lea.hbm %s3035_s3, %s2205_s24 }
  0x1a   : > { %180 = vst [vmem:[#allocation1 + $0x20] ss:$4 sm:$0xff] %v2405_v1  ;;  %s2046_s16 = sshll.u32 %s2042_s27, 4  ;;  %s2047_s16 = int_to_ptr.hbm [resolvable:$true] %s2046_s16 }
  0x20   : > { %v185_v2 = vld.sshfl [vmem:[#allocation1 + $0x10] sm:$0xff pattern:$0x73625140]  ;;  %v181_v3 = vld.sshfl [vmem:[#allocation1] sm:$0xff pattern:$0x73625140] }
  0x21   : > { %205 = vrot.lane.b32.xlu1 %v185_v2, %s2320_s29  ;;  %201 = vrot.lane.b32.xlu0 %v181_v3, %s2320_s29  ;;  %v187_v5 = vld.sshfl [vmem:[#allocation1 + $0x18] sm:$0xff pattern:$0x73625140]  ;;  %v193_v6 = vld.sshfl [vmem:[#allocation1 + $0x30] sm:$0xff pattern:$0x73625140] }
  0x22   : > { %v189_v7 = vld.sshfl [vmem:[#allocation1 + $0x20] sm:$0xff pattern:$0x73625140]  ;;  %v195_v8 = vld.sshfl [vmem:[#allocation1 + $0x38] sm:$0xff pattern:$0x73625140] }
  0x23   : > { %209 = vrot.lane.b32.xlu2 %v189_v7, %s2320_s29  ;;  %v191_v9 = vld.sshfl [vmem:[#allocation1 + $0x28] sm:$0xff pattern:$0x73625140] }
  0x24   : > { %v183_v10 = vld.sshfl [vmem:[#allocation1 + $0x8] sm:$0xff pattern:$0x73625140]  ;;  %382 = vst [vmem:[#allocation1 + $0x20] ss:$4 sm:$0xff] %v2405_v1 }
  0x25   : > { %198 = vst [vmem:[#allocation1] ss:$4 sm:$0xff] %v2409_v4 }
  0x29   : > { %207 = vrot.lane.b32.xlu1 %v187_v5, %s2320_s29  ;;  %203 = vrot.lane.b32.xlu0 %v183_v10, %s2320_s29 }
  0x2b   : > { %211 = vrot.lane.b32.xlu2 %v191_v9, %s2320_s29  ;;  %v2414_v12 = vld.sshfl [vmem:[#allocation1 + $0x20] sm:$0xff pattern:$0x73625140]  ;;  %v2416_v13 = vld.sshfl [vmem:[#allocation1 + $0x28] sm:$0xff pattern:$0x73625140] }
  0x2c   : > { %v199_v11 = vld.sshfl [vmem:[#allocation1] sm:$0xff pattern:$0x73625140]  ;;  %v2418_v14 = vld.sshfl [vmem:[#allocation1 + $0x30] sm:$0xff pattern:$0x73625140] }
  0x2d   : > { %380 = vst [vmem:[#allocation1] ss:$4 sm:$0xff] %v2403_v0  ;;  %v2420_v15 = vld.sshfl [vmem:[#allocation1 + $0x38] sm:$0xff pattern:$0x73625140] }
  0x2e   : > { %535 = vst [vmem:[#allocation1 + $0x20] ss:$4 sm:$0xff] %v2405_v1 }
  0x31   : > { %213 = vrot.lane.b32.xlu0 %v193_v6, %s2320_s29  ;;  %215 = vrot.lane.b32.xlu1 %v195_v8, %s2320_s29 }
  0x33   : > { %217 = vrot.lane.b32.xlu2 %v199_v11, %s2320_s29  ;;  %s2031_s29 = scalar_lea.sflag [#allocation3], %s161_s17 }
  0x34   : > { %v2423_v16 = vld.sshfl [vmem:[#allocation1] sm:$0xff pattern:$0x73625140]  ;;  %v2425_v17 = vld.sshfl [vmem:[#allocation1 + $0x8] sm:$0xff pattern:$0x73625140] }
  0x35   : > { %v2427_v18 = vld.sshfl [vmem:[#allocation1 + $0x10] sm:$0xff pattern:$0x73625140]  ;;  %v2429_v19 = vld.sshfl [vmem:[#allocation1 + $0x18] sm:$0xff pattern:$0x73625140]  ;;  %v398_v8 = vand.u32 %v2425_v17, %v2446_v50 }
  0x36   : > { %391 = vst [vmem:[#allocation1] ss:$4 sm:$0xff] %v2409_v4  ;;  %v544_v21 = vld.sshfl [vmem:[#allocation1 + $0x20] sm:$0xff pattern:$0x73625140]  ;;  %v400_v9 = vand.u32 %v2427_v18, %v2446_v50  ;;  %v396_v18 = vand.u32 %v2423_v16, %v2446_v50  ;;  %v408_v16 = vand.u32 %v2418_v14, %v2446_v50 }
  0x37   : > { %v550_v22 = vld.sshfl [vmem:[#allocation1 + $0x38] sm:$0xff pattern:$0x73625140]  ;;  %v548_v23 = vld.sshfl [vmem:[#allocation1 + $0x30] sm:$0xff pattern:$0x73625140] }
  0x38   : > { %v546_v24 = vld.sshfl [vmem:[#allocation1 + $0x28] sm:$0xff pattern:$0x73625140] }
  0x39   : > { %742 = vst [vmem:[#allocation1 + $0x20] ss:$4 sm:$0xff] %v2405_v1 }
  0x3d   : > { %v2432_v20 = vld.sshfl [vmem:[#allocation1] sm:$0xff pattern:$0x73625140] }
  0x3e   : > { %533 = vst [vmem:[#allocation1] ss:$4 sm:$0xff] %v2403_v0 }
  0x40   : > { %v751_v32 = vld.sshfl [vmem:[#allocation1 + $0x20] sm:$0xff pattern:$0x73625140]  ;;  %v755_v33 = vld.sshfl [vmem:[#allocation1 + $0x30] sm:$0xff pattern:$0x73625140] }
  0x41   : > { %v757_v35 = vld.sshfl [vmem:[#allocation1 + $0x38] sm:$0xff pattern:$0x73625140]  ;;  %v753_v38 = vld.sshfl [vmem:[#allocation1 + $0x28] sm:$0xff pattern:$0x73625140] }
  0x42   : > { %949 = vst [vmem:[#allocation1 + $0x20] ss:$4 sm:$0xff] %v2405_v1 }
  0x45   : > { %v536_v25 = vld.sshfl [vmem:[#allocation1] sm:$0xff pattern:$0x73625140]  ;;  %v540_v26 = vld.sshfl [vmem:[#allocation1 + $0x10] sm:$0xff pattern:$0x73625140] }
  0x46   : > { %555 = vrot.lane.b32.xlu0 %v536_v25, %s2321_s30  ;;  %v538_v27 = vld.sshfl [vmem:[#allocation1 + $0x8] sm:$0xff pattern:$0x73625140]  ;;  %v542_v28 = vld.sshfl [vmem:[#allocation1 + $0x18] sm:$0xff pattern:$0x73625140]  ;;  %559 = vrot.lane.b32.xlu2 %v540_v26, %s2321_s30 }
  0x47   : > { %557 = vrot.lane.b32.xlu1 %v538_v27, %s2321_s30  ;;  %552 = vst [vmem:[#allocation1] ss:$4 sm:$0xff] %v2409_v4  ;;  %v402_v27 = vand.u32 %v2429_v19, %v2446_v50 }
  0x49   : > { %v958_v46 = vld.sshfl [vmem:[#allocation1 + $0x20] sm:$0xff pattern:$0x73625140]  ;;  %v962_v62 = vld.sshfl [vmem:[#allocation1 + $0x30] sm:$0xff pattern:$0x73625140] }
  0x4a   : > { %v964_v10 = vld.sshfl [vmem:[#allocation1 + $0x38] sm:$0xff pattern:$0x73625140]  ;;  %v960_v11 = vld.sshfl [vmem:[#allocation1 + $0x28] sm:$0xff pattern:$0x73625140] }
  0x4b   : > { %1156 = vst [vmem:[#allocation1 + $0x20] ss:$4 sm:$0xff] %v2405_v1 }
  0x4e   : > { %561 = vrot.lane.b32.xlu0 %v542_v28, %s2321_s30  ;;  %v553_v29 = vld.sshfl [vmem:[#allocation1] sm:$0xff pattern:$0x73625140]  ;;  %565 = vrot.lane.b32.xlu2 %v546_v24, %s2321_s30  ;;  %v406_v28 = vand.u32 %v2416_v13, %v2446_v50 }
  0x4f   : > { %563 = vrot.lane.b32.xlu1 %v544_v21, %s2321_s30  ;;  %740 = vst [vmem:[#allocation1] ss:$4 sm:$0xff] %v2403_v0 }
  0x56   : > { %567 = vrot.lane.b32.xlu0 %v548_v23, %s2321_s30  ;;  %v745_v30 = vld.sshfl [vmem:[#allocation1 + $0x8] sm:$0xff pattern:$0x73625140]  ;;  %v749_v31 = vld.sshfl [vmem:[#allocation1 + $0x18] sm:$0xff pattern:$0x73625140] }
  0x57   : > { %569 = vrot.lane.b32.xlu1 %v550_v22, %s2321_s30  ;;  %v743_v34 = vld.sshfl [vmem:[#allocation1] sm:$0xff pattern:$0x73625140]  ;;  %v747_v36 = vld.sshfl [vmem:[#allocation1 + $0x10] sm:$0xff pattern:$0x73625140] }
  0x58   : > { %762 = vrot.lane.b32.xlu2 %v743_v34, %s2322_s4  ;;  %759 = vst [vmem:[#allocation1] ss:$4 sm:$0xff] %v2409_v4 }
  0x5e   : > { %764 = vrot.lane.b32.xlu0 %v745_v30, %s2322_s4  ;;  %v404_v30 = vand.u32 %v2414_v12, %v2446_v50 }
  0x5f   : > { %571 = vrot.lane.b32.xlu1 %v553_v29, %s2321_s30  ;;  %v760_v37 = vld.sshfl [vmem:[#allocation1] sm:$0xff pattern:$0x73625140]  ;;  %s2270_s30 = sshra.s32 %s2047_s16, 4  ;;  %s2271_s30 = int_to_ptr.hbm [resolvable:$true] %s2270_s30 }
  0x60   : > { %766 = vrot.lane.b32.xlu2 %v747_v36, %s2322_s4  ;;  %947 = vst [vmem:[#allocation1] ss:$4 sm:$0xff] %v2403_v0  ;;  %v410_v36 = vand.u32 %v2420_v15, %v2446_v50  ;;  %v1169_v15 = vld.sshfl [vmem:[#allocation1 + $0x30] sm:$0xff pattern:$0x73625140]  ;;  %p2277_p0 = scmp.lt.s32.totalorder %s2271_s30, %s3035_s3 }
  0x66   : > { %768 = vrot.lane.b32.xlu0 %v749_v31, %s2322_s4  ;;  %v1165_v31 = vld.sshfl [vmem:[#allocation1 + $0x20] sm:$0xff pattern:$0x73625140] }
  0x67   : > { %770 = vrot.lane.b32.xlu1 %v751_v32, %s2322_s4  ;;  %v952_v40 = vld.sshfl [vmem:[#allocation1 + $0x8] sm:$0xff pattern:$0x73625140]  ;;  %v950_v41 = vld.sshfl [vmem:[#allocation1] sm:$0xff pattern:$0x73625140] }
  0x68   : > { %772 = vrot.lane.b32.xlu2 %v753_v38, %s2322_s4  ;;  %v956_v45 = vld.sshfl [vmem:[#allocation1 + $0x18] sm:$0xff pattern:$0x73625140]  ;;  %v954_v5 = vld.sshfl [vmem:[#allocation1 + $0x10] sm:$0xff pattern:$0x73625140] }
  0x69   : > { %966 = vst [vmem:[#allocation1] ss:$4 sm:$0xff] %v2409_v4 }
  0x6e   : > { %774 = vrot.lane.b32.xlu0 %v755_v33, %s2322_s4 }
  0x6f   : > { %776 = vrot.lane.b32.xlu1 %v757_v35, %s2322_s4  ;;  %v2516_v35 = vld [vmem:[%s3033_s1] sm:$0xf] }
  0x70   : > { %778 = vrot.lane.b32.xlu2 %v760_v37, %s2322_s4  ;;  %v967_v26 = vld.sshfl [vmem:[#allocation1] sm:$0xff pattern:$0x73625140]  ;;  %s2272_s4 = scalar_lea.hbm %s2271_s30, 36 }
  0x71   : > { %1154 = vst [vmem:[#allocation1] ss:$4 sm:$0xff] %v2403_v0  ;;  %p2273_p11 = scmp.ne.s32.totalorder %s2271_s30, %s2272_s4  ;;  %p2278_p1 = scmp.lt.s32.totalorder %s2276_s7, %s2272_s4 }
  0x73   : > { %p2274_p12 = pnand %p2273_p11, %p2388_p5  ;;  %p2279_p2 = por %p2278_p1, %p2277_p0 }
  0x75   : > { %p2275_p13 = pneg %p2274_p12 }
  0x76   : > { %969 = vrot.lane.b32.xlu0 %v950_v41, %s2323_s5  ;;  %v1171_v41 = vld.sshfl [vmem:[#allocation1 + $0x38] sm:$0xff pattern:$0x73625140] }
  0x77   : > { %971 = vrot.lane.b32.xlu1 %v952_v40, %s2323_s5  ;;  %v412_v40 = vand.u32 %v2432_v20, %v2446_v50  ;;  %p2280_p3 = pnand %p2279_p2, %p2275_p13 }
  0x78   : > { %973 = vrot.lane.b32.xlu2 %v954_v5, %s2323_s5  ;;  %v1159_v29 = vld.sshfl [vmem:[#allocation1 + $0x8] sm:$0xff pattern:$0x73625140]  ;;  %v1161_v13 = vld.sshfl [vmem:[#allocation1 + $0x10] sm:$0xff pattern:$0x73625140] }
  0x79   : > { %v1157_v12 = vld.sshfl [vmem:[#allocation1] sm:$0xff pattern:$0x73625140] }
  0x7d   : > { %v210_v39 = vpop.permute.xlu2 %209 }
  0x7e   : > { %975 = vrot.lane.b32.xlu0 %v956_v45, %s2323_s5 }
  0x7f   : > { %977 = vrot.lane.b32.xlu1 %v958_v46, %s2323_s5 }
  0x80   : > { %979 = vrot.lane.b32.xlu2 %v960_v11, %s2323_s5 }
  0x85   : > { %v212_v44 = vpop.permute.xlu2 %211 }
  0x86   : > { %v224_v49 = vsel %vm219_vm1, %v210_v39, %v212_v44  ;;  %981 = vrot.lane.b32.xlu0 %v962_v62, %s2323_s5 }
  0x87   : > { %v249_v53 = vand.u32 %v2446_v50, %v224_v49  ;;  %983 = vrot.lane.b32.xlu1 %v964_v10, %s2323_s5 }
  0x88   : > { %985 = vrot.lane.b32.xlu2 %v967_v26, %s2323_s5 }
  0x8d   : > { %v218_v2 = vpop.permute.xlu2 %217 }
  0x8e   : > { %v261_v3 = vand.u32 %v2446_v50, %v218_v2  ;;  %1178 = vrot.lane.b32.xlu0 %v1159_v29, %s2325_s8 }
  0x8f   : > { %1180 = vrot.lane.b32.xlu1 %v1161_v13, %s2325_s8 }
  0x93   : > { %v206_v42 = vpop.permute.xlu1 %205  ;;  %v202_v43 = vpop.permute.xlu0 %201 }
  0x96   : > { %1176 = vrot.lane.b32.xlu0 %v1157_v12, %s2325_s8 }
  0x97   : > { %1184 = vrot.lane.b32.xlu1 %v1165_v31, %s2325_s8 }
  0x9b   : > { %v208_v51 = vpop.permute.xlu1 %207  ;;  %v204_v52 = vpop.permute.xlu0 %203 }
  0x9c   : > { %v220_v54 = vsel %vm219_vm1, %v202_v43, %v204_v52  ;;  %v221_v55 = vsel %vm219_vm1, %v204_v52, %v206_v42  ;;  %v222_v56 = vsel %vm219_vm1, %v206_v42, %v208_v51  ;;  %v223_v57 = vsel %vm219_vm1, %v208_v51, %v210_v39  ;;  %v1163_v42 = vld.sshfl [vmem:[#allocation1 + $0x18] sm:$0xff pattern:$0x73625140] }
  0x9d   : > { %v237_v58 = vand.u32 %v2446_v50, %v220_v54  ;;  %v240_v59 = vand.u32 %v2446_v50, %v221_v55  ;;  %v243_v60 = vand.u32 %v2446_v50, %v222_v56  ;;  %v246_v61 = vand.u32 %v2446_v50, %v223_v57  ;;  %1173 = vst [vmem:[#allocation1] ss:$4 sm:$0xff] %v2409_v4  ;;  %v1167_v56 = vld.sshfl [vmem:[#allocation1 + $0x28] sm:$0xff pattern:$0x73625140] }
  0x9e   : > { %1188 = vrot.lane.b32.xlu0 %v1169_v15, %s2325_s8  ;;  %1182 = vrot.lane.b32.xlu2 %v1163_v42, %s2325_s8  ;;  %1363 = vst [vmem:[#allocation1 + $0x20] ss:$4 sm:$0xff] %v2405_v1 }
  0x9f   : > { %270 = vmatpush.bf16.msra.mxu0 %v237_v58  ;;  %283 = vmatpush.bf16.msra.mxu1 %v240_v59 }
  0xa0   : > { %296 = vmatpush.bf16.msra.mxu2 %v243_v60  ;;  %309 = vmatpush.bf16.msra.mxu3 %v246_v61  ;;  %v560_v32 = vpop.permute.xlu2 %559 }
  0xa1   : > { %1190 = vrot.lane.b32.xlu1 %v1171_v41, %s2325_s8 }
  0xa2   : > { %2112 = vmatmul.msk.bf16.vlgmr.msra.gmra.mxu0 %vm228_vm3, %v2460_v63  ;;  %2113 = vmatmul.msk.bf16.vlgmr.msra.gmra.mxu1 %vm228_vm3, %v2460_v63 }
  0xa3   : > { %322 = vmatpush.bf16.msrb.mxu0 %v249_v53  ;;  %2114 = vmatmul.msk.bf16.vlgmr.msra.gmra.mxu2 %vm228_vm3, %v2460_v63  ;;  %v214_v6 = vpop.permute.xlu0 %213  ;;  %v216_v7 = vpop.permute.xlu1 %215 }
  0xa4   : > { %2115 = vmatmul.msk.bf16.vlgmr.msra.gmra.mxu3 %vm228_vm3, %v2460_v63  ;;  %v225_v21 = vsel %vm219_vm1, %v212_v44, %v214_v6  ;;  %v226_v22 = vsel %vm219_vm1, %v214_v6, %v216_v7  ;;  %v227_v23 = vsel %vm219_vm1, %v216_v7, %v218_v2  ;;  %v1174_v45 = vld.sshfl [vmem:[#allocation1] sm:$0xff pattern:$0x73625140]  ;;  %v2566_v6 = vld [vmem:[%s3033_s1 + $0x8] sm:$0xf] }
  0xa5   : > { %v252_v24 = vand.u32 %v2446_v50, %v225_v21  ;;  %v255_v17 = vand.u32 %v2446_v50, %v226_v22  ;;  %v258_v25 = vand.u32 %v2446_v50, %v227_v23  ;;  %1361 = vst [vmem:[#allocation1] ss:$4 sm:$0xff] %v2403_v0  ;;  %v1376_v21 = vld.sshfl [vmem:[#allocation1 + $0x30] sm:$0xff pattern:$0x73625140] }
  0xa6   : > { %1186 = vrot.lane.b32.xlu2 %v1167_v56, %s2325_s8  ;;  %v1378_v22 = vld.sshfl [vmem:[#allocation1 + $0x38] sm:$0xff pattern:$0x73625140] }
  0xa7   : > { %374 = vmatpush.bf16.msra.mxu0 %v261_v3  ;;  %335 = vmatpush.bf16.msrb.mxu1 %v252_v24 }
  0xa8   : > { %348 = vmatpush.bf16.msrb.mxu2 %v255_v17  ;;  %361 = vmatpush.bf16.msrb.mxu3 %v258_v25  ;;  %v566_v43 = vpop.permute.xlu2 %565 }
  0xab   : > { %421 = vmatpush.bf16.msra.mxu1 %v396_v18 }
  0xac   : > { %434 = vmatpush.bf16.msra.mxu2 %v398_v8  ;;  %447 = vmatpush.bf16.msra.mxu3 %v400_v9  ;;  %v1364_v57 = vld.sshfl [vmem:[#allocation1] sm:$0xff pattern:$0x73625140]  ;;  %v1366_v58 = vld.sshfl [vmem:[#allocation1 + $0x8] sm:$0xff pattern:$0x73625140] }
  0xad   : > { %1385 = vrot.lane.b32.xlu0 %v1364_v57, %s2326_s11  ;;  %1387 = vrot.lane.b32.xlu1 %v1366_v58, %s2326_s11  ;;  %v1370_v62 = vld.sshfl [vmem:[#allocation1 + $0x18] sm:$0xff pattern:$0x73625140]  ;;  %v1368_v23 = vld.sshfl [vmem:[#allocation1 + $0x10] sm:$0xff pattern:$0x73625140] }
  0xae   : > { %1192 = vrot.lane.b32.xlu2 %v1174_v45, %s2325_s8  ;;  %1380 = vst [vmem:[#allocation1] ss:$4 sm:$0xff] %v2409_v4 }
  0xb2   : > { %2116 = vmatmul.msk.bf16.vlgmr.msrb.gmra.mxu0 %vm228_vm3, %v2460_v63  ;;  %2117 = vmatmul.msk.bf16.vlgmr.msrb.gmra.mxu1 %vm228_vm3, %v2460_v63  ;;  %v763_v59 = vpop.permute.xlu2 %762 }
  0xb3   : > { %2118 = vmatmul.msk.bf16.vlgmr.msrb.gmra.mxu2 %vm228_vm3, %v2460_v63  ;;  %460 = vmatpush.bf16.msrb.mxu0 %v402_v27 }
  0xb4   : > { %2119 = vmatmul.msk.bf16.vlgmr.msrb.gmra.mxu3 %vm228_vm3, %v2460_v63  ;;  %486 = vmatpush.bf16.msrb.mxu2 %v406_v28 }
  0xb5   : > { %499 = vmatpush.bf16.msrb.mxu3 %v408_v16  ;;  %473 = vmatpush.bf16.msrb.mxu1 %v404_v30  ;;  %v1383_v18 = vld.sshfl [vmem:[#allocation1 + $0x8] sm:$0xff pattern:$0x73625140]  ;;  %v1381_v26 = vld.sshfl [vmem:[#allocation1] sm:$0xff pattern:$0x73625140] }
  0xb6   : > { %1391 = vrot.lane.b32.xlu0 %v1370_v62, %s2326_s11  ;;  %1389 = vrot.lane.b32.xlu2 %v1368_v23, %s2326_s11  ;;  %1573 = vst [vmem:[#allocation1] ss:$4 sm:$0xff] %v2403_v0 }
  0xb8   : > { %v556_v14 = vpop.permute.xlu0 %555 }
  0xb9   : > { %v558_v19 = vpop.permute.xlu1 %557 }
  0xba   : > { %v574_v33 = vsel %vm573_vm4, %v556_v14, %v558_v19  ;;  %v575_v34 = vsel %vm573_vm4, %v558_v19, %v560_v32  ;;  %v767_v11 = vpop.permute.xlu2 %766  ;;  %v1374_v19 = vld.sshfl [vmem:[#allocation1 + $0x28] sm:$0xff pattern:$0x73625140] }
  0xbb   : > { %v586_v37 = vand.u32 %v574_v33, %v2446_v50  ;;  %v589_v38 = vand.u32 %v575_v34, %v2446_v50 }
  0xbd   : > { %v1576_v31 = vld.sshfl [vmem:[#allocation1] sm:$0xff pattern:$0x73625140] }
  0xbe   : > { %1397 = vrot.lane.b32.xlu0 %v1376_v21, %s2326_s11  ;;  %1395 = vrot.lane.b32.xlu2 %v1374_v19, %s2326_s11 }
  0xc0   : > { %v562_v39 = vpop.permute.xlu0 %561 }
  0xc1   : > { %v564_v20 = vpop.permute.xlu1 %563  ;;  %v576_v46 = vsel %vm573_vm4, %v560_v32, %v562_v39  ;;  %v1580_v32 = vld.sshfl [vmem:[#allocation1 + $0x10] sm:$0xff pattern:$0x73625140] }
  0xc2   : > { %2120 = vmatmul.msk.bf16.vlgmr.msra.gmra.mxu0 %vm228_vm3, %v2460_v63  ;;  %2121 = vmatmul.msk.bf16.vlgmr.msra.gmra.mxu1 %vm228_vm3, %v2516_v35  ;;  %v577_v47 = vsel %vm573_vm4, %v562_v39, %v564_v20  ;;  %v578_v48 = vsel %vm573_vm4, %v564_v20, %v566_v43  ;;  %v592_v51 = vand.u32 %v576_v46, %v2446_v50  ;;  %v1372_v63 = vld.sshfl [vmem:[#allocation1 + $0x20] sm:$0xff pattern:$0x73625140]  ;;  %v773_v25 = vpop.permute.xlu2 %772 }
  0xc3   : > { %2122 = vmatmul.msk.bf16.vlgmr.msra.gmra.mxu2 %vm228_vm3, %v2516_v35  ;;  %512 = vmatpush.bf16.msra.mxu0 %v410_v36  ;;  %v595_v52 = vand.u32 %v577_v47, %v2446_v50  ;;  %v598_v54 = vand.u32 %v578_v48, %v2446_v50  ;;  %1575 = vst [vmem:[#allocation1 + $0x20] ss:$4 sm:$0xff] %v2405_v1  ;;  %v1582_v36 = vld.sshfl [vmem:[#allocation1 + $0x18] sm:$0xff pattern:$0x73625140] }
  0xc4   : > { %2123 = vmatmul.msk.bf16.vlgmr.msra.gmra.mxu3 %vm228_vm3, %v2516_v35  ;;  %619 = vmatpush.bf16.msra.mxu2 %v586_v37 }
  0xc5   : > { %632 = vmatpush.bf16.msra.mxu3 %v589_v38  ;;  %525 = vmatpush.bf16.msra.mxu1 %v412_v40  ;;  %v2614_v40 = vld [vmem:[%s3033_s1 + $0xc] sm:$0xf] }
  0xc6   : > { %1393 = vrot.lane.b32.xlu1 %v1372_v63, %s2326_s11  ;;  %1403 = vrot.lane.b32.xlu0 %v1383_v18, %s2326_s11 }
  0xc7   : > { %1401 = vrot.lane.b32.xlu2 %v1381_v26, %s2326_s11 }
  0xc8   : > { %v568_v44 = vpop.permute.xlu0 %567 }
  0xc9   : > { %v579_v49 = vsel %vm573_vm4, %v566_v43, %v568_v44  ;;  %v570_v53 = vpop.permute.xlu1 %569 }
  0xca   : > { %v601_v55 = vand.u32 %v579_v49, %v2446_v50  ;;  %v580_v2 = vsel %vm573_vm4, %v568_v44, %v570_v53  ;;  %v1586_v45 = vld.sshfl [vmem:[#allocation1 + $0x28] sm:$0xff pattern:$0x73625140]  ;;  %v1588_v46 = vld.sshfl [vmem:[#allocation1 + $0x30] sm:$0xff pattern:$0x73625140] }
  0xcb   : > { %v604_v7 = vand.u32 %v580_v2, %v2446_v50  ;;  %v1584_v63 = vld.sshfl [vmem:[#allocation1 + $0x20] sm:$0xff pattern:$0x73625140] }
  0xce   : > { %1399 = vrot.lane.b32.xlu1 %v1378_v22, %s2326_s11  ;;  %1601 = vrot.lane.b32.xlu0 %v1580_v32, %s2327_s20 }
  0xd0   : > { %v765_v61 = vpop.permute.xlu0 %764 }
  0xd1   : > { %v572_v60 = vpop.permute.xlu1 %571  ;;  %v781_v5 = vsel %vm780_vm5, %v763_v59, %v765_v61  ;;  %v782_v27 = vsel %vm780_vm5, %v765_v61, %v767_v11 }
  0xd2   : > { %2124 = vmatmul.msk.bf16.vlgmr.msrb.gmra.mxu0 %vm228_vm3, %v2516_v35  ;;  %2125 = vmatmul.msk.bf16.vlgmr.msrb.gmra.mxu1 %vm228_vm3, %v2516_v35  ;;  %v581_v3 = vsel %vm573_vm4, %v570_v53, %v572_v60  ;;  %v610_v9 = vand.u32 %v572_v60, %v2446_v50  ;;  %v793_v10 = vand.u32 %v781_v5, %v2446_v50 }
  0xd3   : > { %2126 = vmatmul.msk.bf16.vlgmr.msrb.gmra.mxu2 %vm228_vm3, %v2516_v35  ;;  %645 = vmatpush.bf16.msrb.mxu0 %v592_v51  ;;  %v607_v8 = vand.u32 %v581_v3, %v2446_v50  ;;  %v796_v30 = vand.u32 %v782_v27, %v2446_v50 }
  0xd4   : > { %2127 = vmatmul.msk.bf16.vlgmr.msrb.gmra.mxu3 %vm228_vm3, %v2516_v35  ;;  %658 = vmatpush.bf16.msrb.mxu1 %v595_v52 }
  0xd5   : > { %671 = vmatpush.bf16.msrb.mxu2 %v598_v54  ;;  %684 = vmatpush.bf16.msrb.mxu3 %v601_v55  ;;  %v1578_v55 = vld.sshfl [vmem:[#allocation1 + $0x8] sm:$0xff pattern:$0x73625140] }
  0xd6   : > { %1597 = vrot.lane.b32.xlu1 %v1576_v31, %s2327_s20  ;;  %1607 = vrot.lane.b32.xlu0 %v1586_v45, %s2327_s20  ;;  %1592 = vst [vmem:[#allocation1] ss:$4 sm:$0xff] %v2409_v4 }
  0xd7   : > { %1599 = vrot.lane.b32.xlu2 %v1578_v55, %s2327_s20 }
  0xd8   : > { %v769_v24 = vpop.permute.xlu0 %768 }
  0xd9   : > { %v771_v17 = vpop.permute.xlu1 %770  ;;  %v783_v28 = vsel %vm780_vm5, %v767_v11, %v769_v24 }
  0xda   : > { %v784_v16 = vsel %vm780_vm5, %v769_v24, %v771_v17  ;;  %v785_v29 = vsel %vm780_vm5, %v771_v17, %v773_v25  ;;  %v799_v13 = vand.u32 %v783_v28, %v2446_v50 }
  0xdb   : > { %v802_v14 = vand.u32 %v784_v16, %v2446_v50  ;;  %v805_v12 = vand.u32 %v785_v29, %v2446_v50 }
  0xdd   : > { %v1595_v61 = vld.sshfl [vmem:[#allocation1 + $0x8] sm:$0xff pattern:$0x73625140]  ;;  %v1593_v62 = vld.sshfl [vmem:[#allocation1] sm:$0xff pattern:$0x73625140] }
  0xde   : > { %1603 = vrot.lane.b32.xlu1 %v1582_v36, %s2327_s20  ;;  %1613 = vrot.lane.b32.xlu0 %v1593_v62, %s2327_s20  ;;  %1785 = vst [vmem:[#allocation1] ss:$4 sm:$0xff] %v2403_v0 }
  0xdf   : > { %1605 = vrot.lane.b32.xlu2 %v1584_v63, %s2327_s20 }
  0xe0   : > { %v775_v34 = vpop.permute.xlu0 %774 }
  0xe1   : > { %v777_v33 = vpop.permute.xlu1 %776  ;;  %v786_v37 = vsel %vm780_vm5, %v773_v25, %v775_v34  ;;  %v1590_v25 = vld.sshfl [vmem:[#allocation1 + $0x38] sm:$0xff pattern:$0x73625140] }
  0xe2   : > { %2128 = vmatmul.msk.bf16.vlgmr.msra.gmra.mxu0 %vm228_vm3, %v2516_v35  ;;  %2129 = vmatmul.msk.bf16.vlgmr.msra.gmra.mxu1 %vm228_vm3, %v2516_v35  ;;  %v779_v35 = vpop.permute.xlu2 %778  ;;  %v787_v38 = vsel %vm780_vm5, %v775_v34, %v777_v33  ;;  %v808_v15 = vand.u32 %v786_v37, %v2446_v50  ;;  %1787 = vst [vmem:[#allocation1 + $0x20] ss:$4 sm:$0xff] %v2405_v1  ;;  %v2691_v34 = vld [vmem:[%s3033_s1 + $0x10] sm:$0xf] }
  0xe3   : > { %2131 = vmatmul.msk.bf16.vlgmr.msra.gmra.mxu2 %vm228_vm3, %v2566_v6  ;;  %697 = vmatpush.bf16.msra.mxu0 %v604_v7  ;;  %v788_v39 = vsel %vm780_vm5, %v777_v33, %v779_v35  ;;  %v811_v41 = vand.u32 %v787_v38, %v2446_v50  ;;  %v817_v20 = vand.u32 %v779_v35, %v2446_v50 }
  0xe4   : > { %2132 = vmatmul.msk.bf16.vlgmr.msra.gmra.mxu3 %vm228_vm3, %v2566_v6  ;;  %710 = vmatpush.bf16.msra.mxu1 %v607_v8  ;;  %v814_v42 = vand.u32 %v788_v39, %v2446_v50 }
  0xe5   : > { %826 = vmatpush.bf16.msra.mxu3 %v793_v10  ;;  %723 = vmatpush.bf16.msra.mxu2 %v610_v9  ;;  %v1792_v10 = vld.sshfl [vmem:[#allocation1 + $0x10] sm:$0xff pattern:$0x73625140]  ;;  %v1790_v0 = vld.sshfl [vmem:[#allocation1 + $0x8] sm:$0xff pattern:$0x73625140] }
  0xe6   : > { %1609 = vrot.lane.b32.xlu1 %v1588_v46, %s2327_s20  ;;  %1811 = vrot.lane.b32.xlu0 %v1790_v0, %s2328_s26  ;;  %v1794_v35 = vld.sshfl [vmem:[#allocation1 + $0x18] sm:$0xff pattern:$0x73625140] }
  0xe7   : > { %1611 = vrot.lane.b32.xlu2 %v1590_v25, %s2327_s20 }
  0xe8   : > { %v970_v44 = vpop.permute.xlu0 %969 }
  0xe9   : > { %v972_v43 = vpop.permute.xlu1 %971  ;;  %v1798_v29 = vld.sshfl [vmem:[#allocation1 + $0x28] sm:$0xff pattern:$0x73625140] }
  0xea   : > { %v974_v47 = vpop.permute.xlu2 %973  ;;  %v988_v52 = vsel %vm987_vm6, %v970_v44, %v972_v43 }
  0xeb   : > { %v989_v51 = vsel %vm987_vm6, %v972_v43, %v974_v47  ;;  %v1000_v57 = vand.u32 %v988_v52, %v2446_v50 }
  0xec   : > { %v1003_v56 = vand.u32 %v989_v51, %v2446_v50 }
  0xee   : > { %1615 = vrot.lane.b32.xlu1 %v1595_v61, %s2327_s20  ;;  %s2980_s20 = scalar_lea.vmem [#allocation2], %s2203_s19 }
  0xef   : > { %s2044_s28 = sshll.u32 %s2980_s20, 4  ;;  %s2045_s28 = int_to_ptr.vmem [resolvable:$true] %s2044_s28 }
  0xf0   : > { %v976_v48 = vpop.permute.xlu0 %975 }
  0xf1   : > { %v978_v49 = vpop.permute.xlu1 %977  ;;  %v990_v53 = vsel %vm987_vm6, %v974_v47, %v976_v48 }
  0xf2   : > { %2133 = vmatmul.msk.bf16.vlgmr.msrb.gmra.mxu0 %vm228_vm3, %v2566_v6  ;;  %2134 = vmatmul.msk.bf16.vlgmr.msrb.gmra.mxu1 %vm228_vm3, %v2566_v6  ;;  %v991_v54 = vsel %vm987_vm6, %v976_v48, %v978_v49  ;;  %v1006_v58 = vand.u32 %v990_v53, %v2446_v50  ;;  %v980_v59 = vpop.permute.xlu2 %979 }
  0xf3   : > { %2135 = vmatmul.msk.bf16.vlgmr.msrb.gmra.mxu2 %vm228_vm3, %v2566_v6  ;;  %839 = vmatpush.bf16.msrb.mxu0 %v796_v30  ;;  %v1009_v60 = vand.u32 %v991_v54, %v2446_v50  ;;  %v1796_v30 = vld.sshfl [vmem:[#allocation1 + $0x20] sm:$0xff pattern:$0x73625140] }
  0xf4   : > { %2136 = vmatmul.msk.bf16.vlgmr.msrb.gmra.mxu3 %vm228_vm3, %v2566_v6  ;;  %852 = vmatpush.bf16.msrb.mxu1 %v799_v13 }
  0xf5   : > { %865 = vmatpush.bf16.msrb.mxu2 %v802_v14  ;;  %878 = vmatpush.bf16.msrb.mxu3 %v805_v12 }
  0xf6   : > { %1813 = vrot.lane.b32.xlu1 %v1792_v10, %s2328_s26  ;;  %1817 = vrot.lane.b32.xlu0 %v1796_v30, %s2328_s26 }
  0xf8   : > { %v982_v2 = vpop.permute.xlu0 %981 }
  0xf9   : > { %v984_v3 = vpop.permute.xlu1 %983  ;;  %v993_v7 = vsel %vm987_vm6, %v980_v59, %v982_v2 }
  0xfa   : > { %v986_v5 = vpop.permute.xlu2 %985  ;;  %v994_v8 = vsel %vm987_vm6, %v982_v2, %v984_v3  ;;  %v1015_v23 = vand.u32 %v993_v7, %v2446_v50 }
  0xfb   : > { %v995_v9 = vsel %vm987_vm6, %v984_v3, %v986_v5  ;;  %v1018_v24 = vand.u32 %v994_v8, %v2446_v50  ;;  %v1024_v36 = vand.u32 %v986_v5, %v2446_v50  ;;  %v1800_v3 = vld.sshfl [vmem:[#allocation1 + $0x30] sm:$0xff pattern:$0x73625140] }
  0xfc   : > { %v1021_v17 = vand.u32 %v995_v9, %v2446_v50 }
  0xfe   : > { %1819 = vrot.lane.b32.xlu1 %v1798_v29, %s2328_s26 }
 0x100   : > { %v1179_v16 = vpop.permute.xlu0 %1178 }
 0x101   : > { %v1181_v1 = vpop.permute.xlu1 %1180 }
 0x102   : > { %2137 = vmatmul.msk.bf16.vlgmr.msra.gmra.mxu0 %vm228_vm3, %v2566_v6  ;;  %2138 = vmatmul.msk.bf16.vlgmr.msra.gmra.mxu1 %vm228_vm3, %v2566_v6  ;;  %v1183_v13 = vpop.permute.xlu2 %1182  ;;  %v1196_v19 = vsel %vm1194_vm7, %v1179_v16, %v1181_v1 }
 0x103   : > { %2139 = vmatmul.msk.bf16.vlgmr.msra.gmra.mxu2 %vm228_vm3, %v2566_v6  ;;  %891 = vmatpush.bf16.msra.mxu0 %v808_v15  ;;  %v992_v6 = vsel %vm987_vm6, %v978_v49, %v980_v59  ;;  %v1197_v31 = vsel %vm1194_vm7, %v1181_v1, %v1183_v13  ;;  %v1210_v38 = vand.u32 %v1196_v19, %v2446_v50 }
 0x104   : > { %2141 = vmatmul.msk.bf16.vlgmr.msra.gmra.mxu3 %vm228_vm3, %v2614_v40  ;;  %904 = vmatpush.bf16.msra.mxu1 %v811_v41  ;;  %v1012_v22 = vand.u32 %v992_v6, %v2446_v50  ;;  %v1213_v39 = vand.u32 %v1197_v31, %v2446_v50  ;;  %v1788_v41 = vld.sshfl [vmem:[#allocation1] sm:$0xff pattern:$0x73625140] }
 0x105   : > { %917 = vmatpush.bf16.msra.mxu2 %v814_v42  ;;  %930 = vmatpush.bf16.msra.mxu3 %v817_v20  ;;  %1804 = vst [vmem:[#allocation1] ss:$4 sm:$0xff] %v2409_v4  ;;  %v1802_v20 = vld.sshfl [vmem:[#allocation1 + $0x38] sm:$0xff pattern:$0x73625140] }
 0x106   : > { %1823 = vrot.lane.b32.xlu0 %v1802_v20, %s2328_s26  ;;  %1809 = vrot.lane.b32.xlu2 %v1788_v41, %s2328_s26 }
 0x108   : > { %v1177_v37 = vpop.permute.xlu0 %1176 }
 0x109   : > { %v1185_v15 = vpop.permute.xlu1 %1184 }
 0x10a   : > { %v1187_v43 = vpop.permute.xlu2 %1186  ;;  %v1198_v51 = vsel %vm1194_vm7, %v1183_v13, %v1185_v15 }
 0x10b   : > { %v1199_v52 = vsel %vm1194_vm7, %v1185_v15, %v1187_v43 }
 0x10c   : > { %v1805_v47 = vld.sshfl [vmem:[#allocation1] sm:$0xff pattern:$0x73625140]  ;;  %v1219_v61 = vand.u32 %v1199_v52, %v2446_v50 }
 0x10d   : > { %1825 = vrot.lane.b32.xlu1 %v1805_v47, %s2328_s26 }
 0x10e   : > { %1815 = vrot.lane.b32.xlu2 %v1794_v35, %s2328_s26 }
 0x110   : > { %v1189_v48 = vpop.permute.xlu0 %1188 }
 0x111   : > { %v1200_v55 = vsel %vm1194_vm7, %v1187_v43, %v1189_v48 }
 0x112   : > { %2142 = vmatmul.msk.bf16.vlgmr.msrb.gmra.mxu0 %vm228_vm3, %v2614_v40  ;;  %2143 = vmatmul.msk.bf16.vlgmr.msrb.gmra.mxu1 %vm228_vm3, %v2614_v40  ;;  %v1222_v62 = vand.u32 %v1200_v55, %v2446_v50  ;;  %v1193_v2 = vpop.permute.xlu2 %1192 }
 0x113   : > { %2144 = vmatmul.msk.bf16.vlgmr.msrb.gmra.mxu2 %vm228_vm3, %v2614_v40  ;;  %1033 = vmatpush.bf16.msrb.mxu0 %v1000_v57  ;;  %v1191_v49 = vpop.permute.xlu1 %1190  ;;  %v1231_v13 = vand.u32 %v1193_v2, %v2446_v50 }
 0x114   : > { %2145 = vmatmul.msk.bf16.vlgmr.msrb.gmra.mxu3 %vm228_vm3, %v2614_v40  ;;  %1046 = vmatpush.bf16.msrb.mxu1 %v1003_v56  ;;  %v1201_v56 = vsel %vm1194_vm7, %v1189_v48, %v1191_v49 }
 0x115   : > { %1059 = vmatpush.bf16.msrb.mxu2 %v1006_v58  ;;  %1072 = vmatpush.bf16.msrb.mxu3 %v1009_v60  ;;  %v1216_v60 = vand.u32 %v1198_v51, %v2446_v50  ;;  %v1225_v63 = vand.u32 %v1201_v56, %v2446_v50 }
 0x116   : > { %1821 = vrot.lane.b32.xlu2 %v1800_v3, %s2328_s26 }
 0x11f   : > { %v2656_v11 = vpop.f32.mrf.mxu0  ;;  %v2658_v21 = vpop.f32.mrf.mxu1 }
 0x120   : > { %v1388_v0 = vpop.permute.xlu1 %1387 }
 0x122   : > { %2146 = vmatmul.msk.bf16.vlgmr.msra.gmra.mxu0 %vm228_vm3, %v2614_v40  ;;  %2147 = vmatmul.msk.bf16.vlgmr.msra.gmra.mxu1 %vm228_vm3, %v2614_v40 }
 0x123   : > { %2148 = vmatmul.msk.bf16.vlgmr.msra.gmra.mxu2 %vm228_vm3, %v2614_v40  ;;  %1085 = vmatpush.bf16.msra.mxu0 %v1012_v22  ;;  %v1390_v22 = vpop.permute.xlu2 %1389 }
 0x124   : > { %2149 = vmatmul.msk.bf16.vlgmr.msra.gmra.mxu3 %vm228_vm3, %v2614_v40  ;;  %1098 = vmatpush.bf16.msra.mxu1 %v1015_v23  ;;  %v1195_v40 = vsel %vm1194_vm7, %v1177_v37, %v1179_v16  ;;  %v1202_v23 = vsel %vm1194_vm7, %v1191_v49, %v1193_v2 }
 0x125   : > { %1111 = vmatpush.bf16.msra.mxu2 %v1018_v24  ;;  %1124 = vmatpush.bf16.msra.mxu3 %v1021_v17  ;;  %v1207_v42 = vand.u32 %v1195_v40, %v2446_v50  ;;  %v1228_v30 = vand.u32 %v1202_v23, %v2446_v50 }
 0x126   : > { %v2675_v18 = vpop.f32.mrf.mxu2 }
 0x127   : > { %v2677_v26 = vpop.f32.mrf.mxu3  ;;  %v274_v27 = vpop.f32.mrf.mxu0 }
 0x128   : > { %v287_v28 = vpop.f32.mrf.mxu1  ;;  %v1407_v27 = vsel %vm1405_vm8, %v1388_v0, %v1390_v22 }
 0x129   : > { %v1807_v28 = vld.sshfl [vmem:[#allocation1 + $0x8] sm:$0xff pattern:$0x73625140] }
 0x12a   : > { %1827 = vrot.lane.b32.xlu2 %v1807_v28, %s2328_s26 }
 0x12e   : > { %v300_v14 = vpop.f32.mrf.mxu2 }
 0x12f   : > { %v313_v12 = vpop.f32.mrf.mxu3  ;;  %v2684_v32 = vpop.f32.mrf.mxu0 }
 0x130   : > { %v2686_v33 = vpop.f32.mrf.mxu1  ;;  %v1422_v12 = vand.u32 %v1407_v27, %v2446_v50 }
 0x132   : > { %2151 = vmatmul.msk.bf16.vlgmr.msrb.gmra.mxu0 %vm228_vm3, %v2691_v34  ;;  %2152 = vmatmul.msk.bf16.vlgmr.msrb.gmra.mxu1 %vm228_vm3, %v2691_v34 }
 0x133   : > { %2153 = vmatmul.msk.bf16.vlgmr.msrb.gmra.mxu2 %vm228_vm3, %v2691_v34  ;;  %1137 = vmatpush.bf16.msrb.mxu0 %v1024_v36 }
 0x134   : > { %2154 = vmatmul.msk.bf16.vlgmr.msrb.gmra.mxu3 %vm228_vm3, %v2691_v34  ;;  %1240 = vmatpush.bf16.msrb.mxu1 %v1207_v42 }
 0x135   : > { %1253 = vmatpush.bf16.msrb.mxu2 %v1210_v38  ;;  %1266 = vmatpush.bf16.msrb.mxu3 %v1213_v39  ;;  %v1396_v38 = vpop.permute.xlu2 %1395 }
 0x136   : > { %v2707_v44 = vpop.f32.mrf.mxu2 }
 0x137   : > { %v2709_v45 = vpop.f32.mrf.mxu3  ;;  %v326_v4 = vpop.f32.mrf.mxu0 }
 0x138   : > { %v339_v46 = vpop.f32.mrf.mxu1 }
 0x13e   : > { %v352_v53 = vpop.f32.mrf.mxu2 }
 0x13f   : > { %v365_v54 = vpop.f32.mrf.mxu3  ;;  %v2719_v57 = vpop.f32.mrf.mxu0 }
 0x140   : > { %v423_v58 = vpop.f32.mrf.mxu1  ;;  %v1402_v53 = vpop.permute.xlu2 %1401 }
 0x141   : > { %v2722_v59 = vadd.f32 %v423_v58, %v2656_v11  ;;  %v1386_v11 = vpop.permute.xlu0 %1385 }
 0x142   : > { %2155 = vmatmul.msk.bf16.vlgmr.msra.gmra.mxu0 %vm228_vm3, %v2691_v34  ;;  %2156 = vmatmul.msk.bf16.vlgmr.msra.gmra.mxu1 %vm228_vm3, %v2691_v34  ;;  %v1406_v25 = vsel %vm1405_vm8, %v1386_v11, %v1388_v0  ;;  %v2817_v0 = vld [vmem:[%s3033_s1 + $0x18] sm:$0xf] }
 0x143   : > { %2157 = vmatmul.msk.bf16.vlgmr.msra.gmra.mxu2 %vm228_vm3, %v2691_v34  ;;  %1279 = vmatpush.bf16.msra.mxu0 %v1216_v60  ;;  %v1419_v14 = vand.u32 %v1406_v25, %v2446_v50 }
 0x144   : > { %2158 = vmatmul.msk.bf16.vlgmr.msra.gmra.mxu3 %vm228_vm3, %v2691_v34  ;;  %1292 = vmatpush.bf16.msra.mxu1 %v1219_v61 }
 0x145   : > { %1305 = vmatpush.bf16.msra.mxu2 %v1222_v62  ;;  %1318 = vmatpush.bf16.msra.mxu3 %v1225_v63 }
 0x146   : > { %v436_v5 = vpop.f32.mrf.mxu2 }
 0x147   : > { %v449_v6 = vpop.f32.mrf.mxu3  ;;  %v2738_v7 = vadd.f32 %v436_v5, %v2658_v21  ;;  %v378_v9 = vpop.f32.mrf.mxu0 }
 0x148   : > { %v2741_v8 = vadd.f32 %v449_v6, %v2675_v18  ;;  %v425_v10 = vpop.f32.mrf.mxu1  ;;  %v2749_v18 = vld [vmem:[%s3033_s1 + $0x14] sm:$0xf]  ;;  %v1600_v62 = vpop.permute.xlu2 %1599 }
 0x149   : > { %v1392_v19 = vpop.permute.xlu0 %1391 }
 0x14a   : > { %v1408_v40 = vsel %vm1405_vm8, %v1390_v22, %v1392_v19 }
 0x14b   : > { %v1425_v47 = vand.u32 %v1408_v40, %v2446_v50 }
 0x14e   : > { %v438_v24 = vpop.f32.mrf.mxu2 }
 0x14f   : > { %v451_v17 = vpop.f32.mrf.mxu3  ;;  %v462_v21 = vpop.f32.mrf.mxu0 }
 0x150   : > { %v475_v16 = vpop.f32.mrf.mxu1  ;;  %v2753_v1 = vadd.f32 %v462_v21, %v2677_v26  ;;  %v1394_v26 = vpop.permute.xlu1 %1393 }
 0x151   : > { %v2756_v29 = vadd.f32 %v475_v16, %v2684_v32  ;;  %v1398_v39 = vpop.permute.xlu0 %1397  ;;  %v1409_v15 = vsel %vm1405_vm8, %v1392_v19, %v1394_v26  ;;  %v1410_v20 = vsel %vm1405_vm8, %v1394_v26, %v1396_v38 }
 0x152   : > { %2159 = vmatmul.msk.bf16.vlgmr.msrb.gmra.mxu0 %vm228_vm3, %v2691_v34  ;;  %2161 = vmatmul.msk.bf16.vlgmr.msrb.gmra.mxu1 %vm228_vm3, %v2749_v18  ;;  %v1411_v43 = vsel %vm1405_vm8, %v1396_v38, %v1398_v39  ;;  %v1428_v48 = vand.u32 %v1409_v15, %v2446_v50  ;;  %v1431_v49 = vand.u32 %v1410_v20, %v2446_v50 }
 0x153   : > { %2162 = vmatmul.msk.bf16.vlgmr.msrb.gmra.mxu2 %vm228_vm3, %v2749_v18  ;;  %1331 = vmatpush.bf16.msrb.mxu0 %v1228_v30  ;;  %v1434_v52 = vand.u32 %v1411_v43, %v2446_v50  ;;  %v1606_v30 = vpop.permute.xlu2 %1605 }
 0x154   : > { %2163 = vmatmul.msk.bf16.vlgmr.msrb.gmra.mxu3 %vm228_vm3, %v2749_v18  ;;  %1344 = vmatpush.bf16.msrb.mxu1 %v1231_v13 }
 0x155   : > { %1452 = vmatpush.bf16.msrb.mxu2 %v1419_v14  ;;  %1465 = vmatpush.bf16.msrb.mxu3 %v1422_v12 }
 0x156   : > { %v488_v31 = vpop.f32.mrf.mxu2 }
 0x157   : > { %v501_v32 = vpop.f32.mrf.mxu3  ;;  %v2771_v35 = vadd.f32 %v488_v31, %v2686_v33  ;;  %v464_v36 = vpop.f32.mrf.mxu0 }
 0x158   : > { %v2774_v34 = vadd.f32 %v501_v32, %v2707_v44  ;;  %v477_v37 = vpop.f32.mrf.mxu1  ;;  %v1400_v51 = vpop.permute.xlu1 %1399 }
 0x159   : > { %v1412_v63 = vsel %vm1405_vm8, %v1398_v39, %v1400_v51  ;;  %v1413_v2 = vsel %vm1405_vm8, %v1400_v51, %v1402_v53 }
 0x15a   : > { %v1437_v22 = vand.u32 %v1412_v63, %v2446_v50  ;;  %v1440_v23 = vand.u32 %v1413_v2, %v2446_v50 }
 0x15e   : > { %v490_v41 = vpop.f32.mrf.mxu2 }
 0x15f   : > { %v503_v42 = vpop.f32.mrf.mxu3  ;;  %v514_v4 = vpop.f32.mrf.mxu0 }
 0x160   : > { %v527_v33 = vpop.f32.mrf.mxu1  ;;  %v2781_v46 = vadd.f32 %v514_v4, %v2709_v45  ;;  %v1404_v45 = vpop.permute.xlu0 %1403 }
 0x161   : > { %v2784_v44 = vadd.f32 %v527_v33, %v2719_v57  ;;  %v1598_v61 = vpop.permute.xlu1 %1597  ;;  %v1414_v6 = vsel %vm1405_vm8, %v1402_v53, %v1404_v45 }
 0x162   : > { %2164 = vmatmul.msk.bf16.vlgmr.msra.gmra.mxu0 %vm228_vm3, %v2749_v18  ;;  %2165 = vmatmul.msk.bf16.vlgmr.msra.gmra.mxu1 %vm228_vm3, %v2749_v18  ;;  %v1618_v9 = vsel %vm1617_vm9, %v1598_v61, %v1600_v62  ;;  %v1443_v24 = vand.u32 %v1414_v6, %v2446_v50 }
 0x163   : > { %2166 = vmatmul.msk.bf16.vlgmr.msra.gmra.mxu2 %vm228_vm3, %v2749_v18  ;;  %1478 = vmatpush.bf16.msra.mxu0 %v1425_v47  ;;  %v1631_v25 = vand.u32 %v1618_v9, %v2446_v50 }
 0x164   : > { %2167 = vmatmul.msk.bf16.vlgmr.msra.gmra.mxu3 %vm228_vm3, %v2749_v18  ;;  %1491 = vmatpush.bf16.msra.mxu1 %v1428_v48 }
 0x165   : > { %1504 = vmatpush.bf16.msra.mxu2 %v1431_v49  ;;  %1517 = vmatpush.bf16.msra.mxu3 %v1434_v52 }
 0x166   : > { %v621_v54 = vpop.f32.mrf.mxu2 }
 0x167   : > { %v634_v55 = vpop.f32.mrf.mxu3  ;;  %v2799_v56 = vadd.f32 %v621_v54, %v2722_v59  ;;  %v516_v58 = vpop.f32.mrf.mxu0 }
 0x168   : > { %v2802_v57 = vadd.f32 %v634_v55, %v2738_v7  ;;  %v529_v60 = vpop.f32.mrf.mxu1  ;;  %v1602_v17 = vpop.permute.xlu0 %1601 }
 0x169   : > { %v1619_v14 = vsel %vm1617_vm9, %v1600_v62, %v1602_v17  ;;  %v2878_v60 = vld [vmem:[%s3033_s1 + $0x1c] sm:$0xf] }
 0x16a   : > { %v1634_v38 = vand.u32 %v1619_v14, %v2446_v50 }
 0x16e   : > { %v623_v3 = vpop.f32.mrf.mxu2 }
 0x16f   : > { %v636_v5 = vpop.f32.mrf.mxu3  ;;  %v647_v59 = vpop.f32.mrf.mxu0 }
 0x170   : > { %v660_v10 = vpop.f32.mrf.mxu1  ;;  %v2809_v7 = vadd.f32 %v647_v59, %v2741_v8  ;;  %v1604_v8 = vpop.permute.xlu1 %1603 }
 0x171   : > { %v2812_v11 = vadd.f32 %v660_v10, %v2753_v1  ;;  %v1608_v13 = vpop.permute.xlu0 %1607  ;;  %v1620_v12 = vsel %vm1617_vm9, %v1602_v17, %v1604_v8  ;;  %v1621_v31 = vsel %vm1617_vm9, %v1604_v8, %v1606_v30 }
 0x172   : > { %2168 = vmatmul.msk.bf16.vlgmr.msrb.gmra.mxu0 %vm228_vm3, %v2749_v18  ;;  %2169 = vmatmul.msk.bf16.vlgmr.msrb.gmra.mxu1 %vm228_vm3, %v2749_v18  ;;  %v1622_v32 = vsel %vm1617_vm9, %v1606_v30, %v1608_v13  ;;  %v1637_v39 = vand.u32 %v1620_v12, %v2446_v50  ;;  %v1640_v40 = vand.u32 %v1621_v31, %v2446_v50 }
 0x173   : > { %2171 = vmatmul.msk.bf16.vlgmr.msrb.gmra.mxu2 %vm228_vm3, %v2817_v0  ;;  %1530 = vmatpush.bf16.msrb.mxu0 %v1437_v22  ;;  %v1643_v15 = vand.u32 %v1622_v32, %v2446_v50 }
 0x174   : > { %2172 = vmatmul.msk.bf16.vlgmr.msrb.gmra.mxu3 %vm228_vm3, %v2817_v0  ;;  %1543 = vmatpush.bf16.msrb.mxu1 %v1440_v23 }
 0x175   : > { %1556 = vmatpush.bf16.msrb.mxu2 %v1443_v24  ;;  %1664 = vmatpush.bf16.msrb.mxu3 %v1631_v25 }
 0x176   : > { %v673_v27 = vpop.f32.mrf.mxu2 }
 0x177   : > { %v686_v28 = vpop.f32.mrf.mxu3  ;;  %v2832_v21 = vadd.f32 %v673_v27, %v2756_v29  ;;  %v649_v18 = vpop.f32.mrf.mxu0 }
 0x178   : > { %v2835_v16 = vadd.f32 %v686_v28, %v2771_v35  ;;  %v662_v1 = vpop.f32.mrf.mxu1  ;;  %v1610_v41 = vpop.permute.xlu1 %1609 }
 0x179   : > { %v1614_v47 = vpop.permute.xlu0 %1613  ;;  %v1623_v49 = vsel %vm1617_vm9, %v1608_v13, %v1610_v41 }
 0x17a   : > { %v1646_v61 = vand.u32 %v1623_v49, %v2446_v50 }
 0x17e   : > { %v675_v19 = vpop.f32.mrf.mxu2 }
 0x17f   : > { %v688_v26 = vpop.f32.mrf.mxu3  ;;  %v699_v36 = vpop.f32.mrf.mxu0 }
 0x180   : > { %v712_v29 = vpop.f32.mrf.mxu1  ;;  %v2842_v37 = vadd.f32 %v699_v36, %v2774_v34  ;;  %v1612_v34 = vpop.permute.xlu2 %1611 }
 0x181   : > { %v2845_v35 = vadd.f32 %v712_v29, %v2781_v46  ;;  %v1616_v48 = vpop.permute.xlu1 %1615  ;;  %v1624_v51 = vsel %vm1617_vm9, %v1610_v41, %v1612_v34  ;;  %v1625_v45 = vsel %vm1617_vm9, %v1612_v34, %v1614_v47 }
 0x182   : > { %2173 = vmatmul.msk.bf16.vlgmr.msra.gmra.mxu0 %vm228_vm3, %v2817_v0  ;;  %2174 = vmatmul.msk.bf16.vlgmr.msra.gmra.mxu1 %vm228_vm3, %v2817_v0  ;;  %v1626_v54 = vsel %vm1617_vm9, %v1614_v47, %v1616_v48  ;;  %v1649_v62 = vand.u32 %v1624_v51, %v2446_v50  ;;  %v1652_v63 = vand.u32 %v1625_v45, %v2446_v50 }
 0x183   : > { %2175 = vmatmul.msk.bf16.vlgmr.msra.gmra.mxu2 %vm228_vm3, %v2817_v0  ;;  %1677 = vmatpush.bf16.msra.mxu0 %v1634_v38  ;;  %v1655_v2 = vand.u32 %v1626_v54, %v2446_v50 }
 0x184   : > { %2176 = vmatmul.msk.bf16.vlgmr.msra.gmra.mxu3 %vm228_vm3, %v2817_v0  ;;  %1690 = vmatpush.bf16.msra.mxu1 %v1637_v39 }
 0x185   : > { %1703 = vmatpush.bf16.msra.mxu2 %v1640_v40  ;;  %1716 = vmatpush.bf16.msra.mxu3 %v1643_v15 }
 0x186   : > { %v725_v42 = vpop.f32.mrf.mxu2 }
 0x187   : > { %v828_v20 = vpop.f32.mrf.mxu3  ;;  %v2860_v43 = vadd.f32 %v725_v42, %v2784_v44  ;;  %v701_v33 = vpop.f32.mrf.mxu0 }
 0x188   : > { %v2863_v4 = vadd.f32 %v828_v20, %v2799_v56  ;;  %v714_v46 = vpop.f32.mrf.mxu1  ;;  %v1810_v3 = vpop.permute.xlu2 %1809 }
 0x189   : > { %v1814_v22 = vpop.permute.xlu1 %1813  ;;  %v2329_v46 = vmov 0  }
 0x18a   : > { %2255 = vset.pattern.permute.xlu0 %v2329_v46 }
 0x18e   : > { %v727_v52 = vpop.f32.mrf.mxu2 }
 0x18f   : > { %v830_v53 = vpop.f32.mrf.mxu3  ;;  %v841_v55 = vpop.f32.mrf.mxu0 }
 0x190   : > { %v854_v44 = vpop.f32.mrf.mxu1  ;;  %v2870_v58 = vadd.f32 %v841_v55, %v2802_v57  ;;  %v1812_v57 = vpop.permute.xlu0 %1811 }
 0x191   : > { %v2873_v56 = vadd.f32 %v854_v44, %v2809_v7  ;;  %v1831_v24 = vsel %vm1829_vm10, %v1812_v57, %v1814_v22  ;;  %v1830_v17 = vsel %vm1829_vm10, %v1810_v3, %v1812_v57  ;;  %v1820_v19 = vpop.permute.xlu1 %1819 }
 0x192   : > { %2177 = vmatmul.msk.bf16.vlgmr.msrb.gmra.mxu0 %vm228_vm3, %v2817_v0  ;;  %2178 = vmatmul.msk.bf16.vlgmr.msrb.gmra.mxu1 %vm228_vm3, %v2817_v0  ;;  %v1846_v30 = vand.u32 %v1831_v24, %v2446_v50  ;;  %v1843_v13 = vand.u32 %v1830_v17, %v2446_v50 }
 0x193   : > { %2179 = vmatmul.msk.bf16.vlgmr.msrb.gmra.mxu2 %vm228_vm3, %v2817_v0  ;;  %1729 = vmatpush.bf16.msrb.mxu0 %v1646_v61  ;;  %v1816_v0 = vpop.permute.xlu2 %1815 }
 0x194   : > { %2181 = vmatmul.msk.bf16.vlgmr.msrb.gmra.mxu3 %vm228_vm3, %v2878_v60  ;;  %1742 = vmatpush.bf16.msrb.mxu1 %v1649_v62  ;;  %v1832_v27 = vsel %vm1829_vm10, %v1814_v22, %v1816_v0 }
 0x195   : > { %1755 = vmatpush.bf16.msrb.mxu2 %v1652_v63  ;;  %1768 = vmatpush.bf16.msrb.mxu3 %v1655_v2  ;;  %v1849_v14 = vand.u32 %v1832_v27, %v2446_v50 }
 0x196   : > { %v867_v5 = vpop.f32.mrf.mxu2 }
 0x197   : > { %v880_v6 = vpop.f32.mrf.mxu3  ;;  %v2893_v9 = vadd.f32 %v867_v5, %v2812_v11  ;;  %v843_v10 = vpop.f32.mrf.mxu0 }
 0x198   : > { %v2896_v59 = vadd.f32 %v880_v6, %v2832_v21  ;;  %v856_v7 = vpop.f32.mrf.mxu1  ;;  %v1818_v23 = vpop.permute.xlu0 %1817 }
 0x199   : > { %v1833_v11 = vsel %vm1829_vm10, %v1816_v0, %v1818_v23  ;;  %v1826_v39 = vpop.permute.xlu1 %1825  ;;  %v1834_v40 = vsel %vm1829_vm10, %v1818_v23, %v1820_v19 }
 0x19a   : > { %v1852_v12 = vand.u32 %v1833_v11, %v2446_v50  ;;  %v1855_v49 = vand.u32 %v1834_v40, %v2446_v50 }
 0x19e   : > { %v869_v25 = vpop.f32.mrf.mxu2 }
 0x19f   : > { %v882_v8 = vpop.f32.mrf.mxu3  ;;  %v893_v28 = vpop.f32.mrf.mxu0 }
 0x1a0   : > { %v906_v18 = vpop.f32.mrf.mxu1  ;;  %v2903_v21 = vadd.f32 %v893_v28, %v2835_v16  ;;  %v1824_v38 = vpop.permute.xlu0 %1823 }
 0x1a1   : > { %v2906_v1 = vadd.f32 %v906_v18, %v2842_v37  ;;  %v1822_v37 = vpop.permute.xlu2 %1821  ;;  %v1837_v20 = vsel %vm1829_vm10, %v1824_v38, %v1826_v39 }
 0x1a2   : > { %2182 = vmatmul.msk.bf16.vlgmr.msra.gmra.mxu0 %vm228_vm3, %v2878_v60  ;;  %2183 = vmatmul.msk.bf16.vlgmr.msra.gmra.mxu1 %vm228_vm3, %v2878_v60  ;;  %v1835_v15 = vsel %vm1829_vm10, %v1820_v19, %v1822_v37  ;;  %v1836_v42 = vsel %vm1829_vm10, %v1822_v37, %v1824_v38  ;;  %v1864_v53 = vand.u32 %v1837_v20, %v2446_v50 }
 0x1a3   : > { %2184 = vmatmul.msk.bf16.vlgmr.msra.gmra.mxu2 %vm228_vm3, %v2878_v60  ;;  %1876 = vmatpush.bf16.msra.mxu0 %v1843_v13  ;;  %v1858_v51 = vand.u32 %v1835_v15, %v2446_v50  ;;  %v1861_v52 = vand.u32 %v1836_v42, %v2446_v50 }
 0x1a4   : > { %2185 = vmatmul.msk.bf16.vlgmr.msra.gmra.mxu3 %vm228_vm3, %v2878_v60  ;;  %1889 = vmatpush.bf16.msra.mxu1 %v1846_v30 }
 0x1a5   : > { %1902 = vmatpush.bf16.msra.mxu2 %v1849_v14  ;;  %1915 = vmatpush.bf16.msra.mxu3 %v1852_v12 }
 0x1a6   : > { %v919_v16 = vpop.f32.mrf.mxu2 }
 0x1a7   : > { %v932_v26 = vpop.f32.mrf.mxu3  ;;  %v943_v31 = vadd.f32 %v919_v16, %v2845_v35  ;;  %v895_v36 = vpop.f32.mrf.mxu0 }
 0x1a8   : > { %v2922_v32 = vadd.f32 %v932_v26, %v2860_v43  ;;  %v908_v29 = vpop.f32.mrf.mxu1  ;;  %v1995_v43 = vld [vmem:[%s3034_s2] sm:$0xff] }
 0x1a9   : > { %1998 = vperm.xlu0 %2255, %v1995_v43   ;;  %v1828_v61 = vpop.permute.xlu2 %1827 }
 0x1aa   : > { %v1838_v62 = vsel %vm1829_vm10, %v1826_v39, %v1828_v61 }
 0x1ae   : > { %v921_v41 = vpop.f32.mrf.mxu2 }
 0x1af   : > { %v934_v34 = vpop.f32.mrf.mxu3  ;;  %v1035_v33 = vpop.f32.mrf.mxu0 }
 0x1b0   : > { %v1048_v35 = vpop.f32.mrf.mxu1  ;;  %v1143_v47 = vadd.f32 %v1035_v33, %v2863_v4 }
 0x1b1   : > { %v1144_v48 = vadd.f32 %v1048_v35, %v2870_v58 }
 0x1b2   : > { %2186 = vmatmul.msk.bf16.vlgmr.msrb.gmra.mxu0 %vm228_vm3, %v2878_v60  ;;  %2187 = vmatmul.msk.bf16.vlgmr.msrb.gmra.mxu1 %vm228_vm3, %v2878_v60 }
 0x1b3   : > { %2188 = vmatmul.msk.bf16.vlgmr.msrb.gmra.mxu2 %vm228_vm3, %v2878_v60  ;;  %1928 = vmatpush.bf16.msrb.mxu0 %v1855_v49 }
 0x1b4   : > { %2189 = vmatmul.msk.bf16.vlgmr.msrb.gmra.mxu3 %vm228_vm3, %v2878_v60  ;;  %1941 = vmatpush.bf16.msrb.mxu1 %v1858_v51  ;;  %v2190_v60 = vld [vmem:[%s3033_s1 + $0x20] sm:$0xf] }
 0x1b5   : > { %1954 = vmatpush.bf16.msrb.mxu2 %v1861_v52  ;;  %1967 = vmatpush.bf16.msrb.mxu3 %v1864_v53 }
 0x1b6   : > { %v1061_v4 = vpop.f32.mrf.mxu2 }
 0x1b7   : > { %v1074_v45 = vpop.f32.mrf.mxu3  ;;  %v1145_v54 = vadd.f32 %v1061_v4, %v2873_v56  ;;  %v1037_v44 = vpop.f32.mrf.mxu0  ;;  %v1867_v56 = vand.u32 %v1838_v62, %v2446_v50 }
 0x1b8   : > { %v1146_v55 = vadd.f32 %v1074_v45, %v2893_v9  ;;  %v1050_v58 = vpop.f32.mrf.mxu1 }
 0x1be   : > { %v1063_v63 = vpop.f32.mrf.mxu2 }
 0x1bf   : > { %v1076_v2 = vpop.f32.mrf.mxu3  ;;  %v1087_v3 = vpop.f32.mrf.mxu0 }
 0x1c0   : > { %v1100_v57 = vpop.f32.mrf.mxu1  ;;  %v1147_v5 = vadd.f32 %v1087_v3, %v2896_v59 }
 0x1c1   : > { %v1148_v6 = vadd.f32 %v1100_v57, %v2903_v21 }
 0x1c2   : > { %2191 = vmatmul.msk.bf16.vlgmr.msra.gmra.mxu0 %vm228_vm3, %v2190_v60  ;;  %2192 = vmatmul.msk.bf16.vlgmr.msra.gmra.mxu1 %vm228_vm3, %v2190_v60 }
 0x1c3   : > { %2193 = vmatmul.msk.bf16.vlgmr.msra.gmra.mxu2 %vm228_vm3, %v2190_v60  ;;  %1980 = vmatpush.bf16.msra.mxu0 %v1867_v56 }
 0x1c4   : > { %2194 = vmatmul.msk.bf16.vlgmr.msra.gmra.mxu3 %vm228_vm3, %v2190_v60 }
 0x1c6   : > { %v1113_v9 = vpop.f32.mrf.mxu2 }
 0x1c7   : > { %v1126_v10 = vpop.f32.mrf.mxu3  ;;  %v1149_v7 = vadd.f32 %v1113_v9, %v2906_v1  ;;  %v1089_v0 = vpop.f32.mrf.mxu0 }
 0x1c8   : > { %v1150_v22 = vadd.f32 %v1126_v10, %v943_v31  ;;  %v1102_v59 = vpop.f32.mrf.mxu1 }
 0x1ce   : > { %v1115_v23 = vpop.f32.mrf.mxu2 }
 0x1cf   : > { %v1128_v24 = vpop.f32.mrf.mxu3  ;;  %v1139_v17 = vpop.f32.mrf.mxu0 }
 0x1d0   : > { %v1242_v50 = vpop.f32.mrf.mxu1  ;;  %v1151_v25 = vadd.f32 %v1139_v17, %v2922_v32 }
 0x1d1   : > { %v1350_v8 = vadd.f32 %v1242_v50, %v1143_v47 }
 0x1d2   : > { %2195 = vmatmul.msk.bf16.vlgmr.msrb.gmra.mxu0 %vm228_vm3, %v2190_v60  ;;  %2196 = vmatmul.msk.bf16.vlgmr.msrb.gmra.mxu1 %vm228_vm3, %v2190_v60 }
 0x1d3   : > { %2197 = vmatmul.msk.bf16.vlgmr.msrb.gmra.mxu2 %vm228_vm3, %v2190_v60 }
 0x1d4   : > { %2198 = vmatmul.msk.bf16.vlgmr.msrb.gmra.mxu3 %vm228_vm3, %v2190_v60 }
 0x1d6   : > { %v1255_v27 = vpop.f32.mrf.mxu2 }
 0x1d7   : > { %v1268_v11 = vpop.f32.mrf.mxu3  ;;  %v1351_v28 = vadd.f32 %v1255_v27, %v1144_v48  ;;  %v1141_v21 = vpop.f32.mrf.mxu0 }
 0x1d8   : > { %v1352_v18 = vadd.f32 %v1268_v11, %v1145_v54  ;;  %v1244_v1 = vpop.f32.mrf.mxu1 }
 0x1de   : > { %v1257_v30 = vpop.f32.mrf.mxu2 }
 0x1df   : > { %v1270_v13 = vpop.f32.mrf.mxu3  ;;  %v1281_v14 = vpop.f32.mrf.mxu0 }
 0x1e0   : > { %v1294_v12 = vpop.f32.mrf.mxu1  ;;  %v1353_v19 = vadd.f32 %v1281_v14, %v1146_v55 }
 0x1e1   : > { %v1354_v16 = vadd.f32 %v1294_v12, %v1147_v5 }
 0x1e2   : > { %2199 = vmatmul.msk.bf16.vlgmr.msra.gmra.mxu0 %vm228_vm3, %v2190_v60 }
 0x1e6   : > { %v1307_v26 = vpop.f32.mrf.mxu2 }
 0x1e7   : > { %v1320_v31 = vpop.f32.mrf.mxu3  ;;  %v1355_v32 = vadd.f32 %v1307_v26, %v1148_v6  ;;  %v1283_v29 = vpop.f32.mrf.mxu0 }
 0x1e8   : > { %v1356_v36 = vadd.f32 %v1320_v31, %v1149_v7  ;;  %v1296_v37 = vpop.f32.mrf.mxu1 }
 0x1ee   : > { %v1309_v38 = vpop.f32.mrf.mxu2 }
 0x1ef   : > { %v1322_v39 = vpop.f32.mrf.mxu3  ;;  %v1333_v40 = vpop.f32.mrf.mxu0 }
 0x1f0   : > { %v1346_v15 = vpop.f32.mrf.mxu1  ;;  %v1357_v41 = vadd.f32 %v1333_v40, %v1150_v22 }
 0x1f1   : > { %v1358_v34 = vadd.f32 %v1346_v15, %v1151_v25 }
 0x1f6   : > { %v1454_v42 = vpop.f32.mrf.mxu2 }
 0x1f7   : > { %v1467_v20 = vpop.f32.mrf.mxu3  ;;  %v1562_v33 = vadd.f32 %v1454_v42, %v1350_v8  ;;  %v1335_v46 = vpop.f32.mrf.mxu0 }
 0x1f8   : > { %v1563_v35 = vadd.f32 %v1467_v20, %v1351_v28  ;;  %v1348_v43 = vpop.f32.mrf.mxu1 }
 0x1fe   : > { %v1456_v47 = vpop.f32.mrf.mxu2 }
 0x1ff   : > { %v1469_v48 = vpop.f32.mrf.mxu3  ;;  %v1480_v49 = vpop.f32.mrf.mxu0 }
 0x200   : > { %v1493_v51 = vpop.f32.mrf.mxu1  ;;  %v1564_v52 = vadd.f32 %v1480_v49, %v1352_v18 }
 0x201   : > { %v1565_v53 = vadd.f32 %v1493_v51, %v1353_v19 }
 0x206   : > { %v1506_v4 = vpop.f32.mrf.mxu2 }
 0x207   : > { %v1519_v45 = vpop.f32.mrf.mxu3  ;;  %v1566_v54 = vadd.f32 %v1506_v4, %v1354_v16  ;;  %v1482_v44 = vpop.f32.mrf.mxu0 }
 0x208   : > { %v1567_v55 = vadd.f32 %v1519_v45, %v1355_v32  ;;  %v1495_v58 = vpop.f32.mrf.mxu1 }
 0x20e   : > { %v1508_v61 = vpop.f32.mrf.mxu2 }
 0x20f   : > { %v1521_v62 = vpop.f32.mrf.mxu3  ;;  %v1532_v63 = vpop.f32.mrf.mxu0 }
 0x210   : > { %v1545_v2 = vpop.f32.mrf.mxu1  ;;  %v2965_v3 = vadd.f32 %v1532_v63, %v1356_v36 }
 0x211   : > { %v2967_v57 = vadd.f32 %v1545_v2, %v1357_v41 }
 0x216   : > { %v1558_v60 = vpop.f32.mrf.mxu2 }
 0x217   : > { %v1666_v5 = vpop.f32.mrf.mxu3  ;;  %v2969_v6 = vadd.f32 %v1558_v60, %v1358_v34  ;;  %v1534_v56 = vpop.f32.mrf.mxu0 }
 0x218   : > { %v1547_v9 = vpop.f32.mrf.mxu1  ;;  %v1774_v30 = vadd.f32 %v1666_v5, %v1562_v33 }
 0x21b   : > { %v2973_v1 = vpop.permute.xlu0 %1998 }
 0x21e   : > { %v1560_v10 = vpop.f32.mrf.mxu2 }
 0x21f   : > { %v1668_v7 = vpop.f32.mrf.mxu3  ;;  %v1679_v22 = vpop.f32.mrf.mxu0 }
 0x220   : > { %v1692_v0 = vpop.f32.mrf.mxu1  ;;  %v1775_v13 = vadd.f32 %v1679_v22, %v1563_v35 }
 0x221   : > { %v1776_v38 = vadd.f32 %v1692_v0, %v1564_v52 }
 0x226   : > { %v1705_v59 = vpop.f32.mrf.mxu2 }
 0x227   : > { %v1718_v23 = vpop.f32.mrf.mxu3  ;;  %v1681_v24 = vpop.f32.mrf.mxu0  ;;  %v1777_v39 = vadd.f32 %v1705_v59, %v1565_v53 }
 0x228   : > { %v1694_v17 = vpop.f32.mrf.mxu1  ;;  %v1778_v49 = vadd.f32 %v1718_v23, %v1566_v54 }
 0x22e   : > { %v1707_v50 = vpop.f32.mrf.mxu2 }
 0x22f   : > { %v1720_v25 = vpop.f32.mrf.mxu3  ;;  %v1731_v8 = vpop.f32.mrf.mxu0 }
 0x230   : > { %v1744_v27 = vpop.f32.mrf.mxu1  ;;  %v1779_v51 = vadd.f32 %v1731_v8, %v1567_v55 }
 0x231   : > { %v1780_v60 = vadd.f32 %v1744_v27, %v2965_v3 }
 0x236   : > { %v1757_v11 = vpop.f32.mrf.mxu2 }
 0x237   : > { %v2971_v28 = vpop.f32.mrf.mxu3  ;;  %v1733_v18 = vpop.f32.mrf.mxu0  ;;  %v1781_v54 = vadd.f32 %v1757_v11, %v2967_v57 }
 0x238   : > { %v1746_v21 = vpop.f32.mrf.mxu1  ;;  %v1782_v57 = vadd.f32 %v2971_v28, %v2969_v6 }
 0x23e   : > { %v1759_v14 = vpop.f32.mrf.mxu2 }
 0x23f   : > { %v1772_v12 = vpop.f32.mrf.mxu3  ;;  %v1878_v19 = vpop.f32.mrf.mxu0 }
 0x240   : > { %v1891_v16 = vpop.f32.mrf.mxu1  ;;  %v1986_v26 = vadd.f32 %v1878_v19, %v1774_v30 }
 0x241   : > { %v1987_v31 = vadd.f32 %v1891_v16, %v1775_v13 }
 0x242   : > { %v2001_v32 = vadd.f32 %v2973_v1, %v1986_v26 }
 0x243   : > { %v2002_v36 = vadd.f32 %v2973_v1, %v1987_v31 }
 0x244   : > { %v2010_v29 = vmax.f32 %v2001_v32, 0.0 }
 0x245   : > { %v2011_v37 = vmax.f32 %v2002_v36, 0.0 }
 0x246   : > { %v1904_v40 = vpop.f32.mrf.mxu2 }
 0x247   : > { %v1917_v15 = vpop.f32.mrf.mxu3  ;;  %v2019_v41 = vpack.c.bf16 %v2011_v37, %v2010_v29  ;;  %v1988_v34 = vadd.f32 %v1904_v40, %v1776_v38  ;;  %v1880_v20 = vpop.f32.mrf.mxu0 }
 0x248   : > { %v1989_v42 = vadd.f32 %v1917_v15, %v1777_v39  ;;  %v1893_v33 = vpop.f32.mrf.mxu1 }
 0x249   : > { %2024 = vst [vmem:[%s2980_s20] sm:$0xff] %v2019_v41  ;;  %v2003_v35 = vadd.f32 %v2973_v1, %v1988_v34 }
 0x24a   : > { %v2004_v46 = vadd.f32 %v2973_v1, %v1989_v42 }
 0x24b   : > { %v2012_v43 = vmax.f32 %v2003_v35, 0.0 }
 0x24c   : > { %v2013_v47 = vmax.f32 %v2004_v46, 0.0 }
 0x24e   : > { %v2020_v48 = vpack.c.bf16 %v2013_v47, %v2012_v43  ;;  %v1906_v52 = vpop.f32.mrf.mxu2 }
 0x24f   : > { %v1919_v53 = vpop.f32.mrf.mxu3  ;;  %v1930_v4 = vpop.f32.mrf.mxu0 }
 0x250   : > { %2025 = vst [vmem:[%s2980_s20 + $0x8] sm:$0xff] %v2020_v48  ;;  %v1943_v45 = vpop.f32.mrf.mxu1  ;;  %v1990_v44 = vadd.f32 %v1930_v4, %v1778_v49 }
 0x251   : > { %v1991_v58 = vadd.f32 %v1943_v45, %v1779_v51 }
 0x252   : > { %v2005_v61 = vadd.f32 %v2973_v1, %v1990_v44 }
 0x253   : > { %v2006_v62 = vadd.f32 %v2973_v1, %v1991_v58 }
 0x254   : > { %v2014_v63 = vmax.f32 %v2005_v61, 0.0 }
 0x255   : > { %v2015_v2 = vmax.f32 %v2006_v62, 0.0 }
 0x256   : > { %v1956_v5 = vpop.f32.mrf.mxu2 }
 0x257   : > { %v2021_v55 = vpack.c.bf16 %v2015_v2, %v2014_v63  ;;  %v1969_v56 = vpop.f32.mrf.mxu3  ;;  %v1992_v9 = vadd.f32 %v1956_v5, %v1780_v60  ;;  %v1932_v7 = vpop.f32.mrf.mxu0 }
 0x258   : > { %v1993_v10 = vadd.f32 %v1969_v56, %v1781_v54  ;;  %v1945_v22 = vpop.f32.mrf.mxu1 }
 0x259   : > { %2026 = vst [vmem:[%s2980_s20 + $0x10] sm:$0xff] %v2021_v55  ;;  %v2007_v0 = vadd.f32 %v2973_v1, %v1992_v9 }
 0x25a   : > { %v2008_v59 = vadd.f32 %v2973_v1, %v1993_v10 }
 0x25b   : > { %v2016_v23 = vmax.f32 %v2007_v0, 0.0 }
 0x25c   : > { %v2017_v24 = vmax.f32 %v2008_v59, 0.0 }
 0x25e   : > { %v2022_v3 = vpack.c.bf16 %v2017_v24, %v2016_v23  ;;  %v1958_v17 = vpop.f32.mrf.mxu2 }
 0x25f   : > { %v1971_v50 = vpop.f32.mrf.mxu3  ;;  %v1982_v25 = vpop.f32.mrf.mxu0 }
 0x260   : > { %2027 = vst [vmem:[%s2980_s20 + $0x18] sm:$0xff] %v2022_v3  ;;  %v1994_v8 = vadd.f32 %v1982_v25, %v1782_v57 }
 0x262   : > { %v2009_v27 = vadd.f32 %v2973_v1, %v1994_v8 }
 0x264   : > { %v2018_v11 = vmax.f32 %v2009_v27, 0.0 }
 0x266   : > { %v2023_v18 = vpack.c.bf16 %v2018_v11, %v2018_v11 }
 0x267   : > { %v1984_v6 = vpop.f32.mrf.mxu0 }
 0x268   : > { %2029 = vst.msk [vmem:[%s2980_s20 + $0x20] sm:$0xf] %vm2028_vm11, %v2023_v18 }
 0x269   : > { %2283 = shalt.err (!%p2280_p3)
}
 0x26a   : > { %2206 = dma.vmem_to_hbm [thread:$0]  (%p2388_p5), %s2045_s28, 576, %s2047_s16, %s2031_s29  }
 0x26b PF: > { %p2212_p4 = scmp.ge.s32.totalorder %s2318_s15, 2  ;;  %s2058_s10 = sand.u32 1, %s2306_s12  }
 0x26c   : > { %s2059_s11 = scalar_lea.sflag [#allocation3], %s2058_s10 }
 0x26d   : > { %p2209_p7 = pnand %p2212_p4, %p2392_p6 }
 0x26f   : > { %p2210_p8 = pneg %p2209_p7 }
 0x271   : > { %2301 = dma.done.wait (%p2210_p8), %s2059_s11, 576  }
 0x272   : > { %2303 = vsyncadd (%p2210_p8), %s2059_s11, 4294966720  ;;  %p13_p9 = scmp.ge.s32.totalorder %s2375_s18, 4   ;;  %s3038_s12 = smov %s2310_s13 }
 0x273   : > { %s3039_s13 = smov %s2314_s14  ;;  %s3040_s14 = smov %s2386_s21 }
 0x274   : > { %s3041_s15 = smov %s2375_s18  ;;  %15 = sbr.rel (!%p13_p9) target bundleno = 3 (0x3), region = 84 }
 0x279   :  { %2065 = vsyncpa [#allocation3], 1 }
 0x27a   :  { %2067 = vsyncpa [#allocation3 + $0x1], 1 }

</bundles_post_ra>
